<compile_context>
chip_gen: v7x
topology: tpu7x:2x2x1
jax: 0.10.0
libtpu: 0.0.40
codegen_flags: <defaults>
</compile_context>

<pallas_src>
import jax
import jax.numpy as jnp
import numpy as np
from jax import lax
from jax.experimental import pallas as pl
from jax.experimental.pallas import tpu as pltpu

HIDDEN = 32      # hidden_size (module spec uses 256; small shape for the test)
VOCAB = 64       # output_size
LANE = 128       # TPU lane width: pad H and V up to this for aligned layouts
NEG_INF = -1e30  # bias for padded vocab columns


def _round_up(x, m):
    return ((x + m - 1) // m) * m


def _decoder_kernel(tok_ref,       # SMEM scalar-prefetch: (T,) int32 token ids
                    emb_ref,       # (V, HP)  f32 embedding table, VMEM resident
                    h0_ref,        # (1, HP)  f32 initial hidden state
                    w_ih_ref,      # (HP, 3*HP) bf16 input->gates, stacked (r,z,n)
                    w_hh_ref,      # (HP, 3*HP) bf16 hidden->gates, stacked (r,z,n)
                    b_ih_ref,      # (1, 3*HP) f32
                    b_hh_ref,      # (1, 3*HP) f32
                    w_out_ref,     # (HP, VP)  bf16 output projection, h @ W
                    b_out_ref,     # (1, VP)   f32, padded cols hold -1e30
                    logp_ref,      # out: (T, VP) per-step log-probabilities
                    h_out_ref,     # out: (1, HP) final hidden state
                    x_scratch,     # VMEM (T, HP)   f32: relu(emb[toks])
                    gx_scratch,    # VMEM (T, 3*HP) f32: input-side gate pre-acts
                    h_hist):       # VMEM (T, HP)   f32: per-step hidden history
    hp = h0_ref.shape[-1]
    n_steps = logp_ref.shape[0]

    # ---- Phase 1 (token-parallel, hoisted off the recurrence) -------------
    # Gather the T embedding rows + ReLU, then one batched MXU pass for every
    # step's input-side gate pre-activations: (T,HP) @ (HP,3HP).
    for t in range(n_steps):                       # static, tiny T
        tok = tok_ref[t]
        x_scratch[pl.ds(t, 1), :] = jnp.maximum(emb_ref[pl.ds(tok, 1), :], 0.0)

    gx_scratch[...] = (
        jnp.dot(x_scratch[...].astype(jnp.bfloat16), w_ih_ref[...],
                preferred_element_type=jnp.float32) + b_ih_ref[...])

    # ---- Phase 2: the truly serial recurrence ------------------------------
    # Only the h-dependent dot + gate elementwise remain on the critical path.
    w_hh = w_hh_ref[...]
    b_hh = b_hh_ref[...]

    def step(t, h):                                # h carried in vregs
        gx = gx_scratch[pl.ds(t, 1), :]            # (1, 3HP) f32
        gh = jnp.dot(h.astype(jnp.bfloat16), w_hh,
                     preferred_element_type=jnp.float32) + b_hh

        # Gate slices are whole 128-lane-aligned columns (hp == 128).
        r = jax.nn.sigmoid(gx[:, 0 * hp:1 * hp] + gh[:, 0 * hp:1 * hp])
        z = jax.nn.sigmoid(gx[:, 1 * hp:2 * hp] + gh[:, 1 * hp:2 * hp])
        n = jnp.tanh(gx[:, 2 * hp:3 * hp] + r * gh[:, 2 * hp:3 * hp])
        h_new = (1.0 - z) * n + z * h

        h_hist[pl.ds(t, 1), :] = h_new             # for the batched projection
        return h_new

    unroll = True if n_steps <= 16 else 8          # bounded unroll for long T
    h_final = lax.fori_loop(0, n_steps, step, h0_ref[...], unroll=unroll)
    h_out_ref[...] = h_final

    # ---- Phase 3 (token-parallel): batched projection + log_softmax --------
    logits = (jnp.dot(h_hist[...].astype(jnp.bfloat16), w_out_ref[...],
                      preferred_element_type=jnp.float32) + b_out_ref[...])
    m = jnp.max(logits, axis=-1, keepdims=True)
    s = logits - m
    lse = jnp.log(jnp.sum(jnp.exp(s), axis=-1, keepdims=True))
    logp_ref[...] = s - lse                        # one lane-dense (T, VP) store


def decoder_rnn_decode(tokens, hidden, packed):
    """Run T fused decoder steps in one pallas_call.

    tokens: (T,) int32; hidden: (1, 1, H) f32.
    Returns (log_probs (T, V), final hidden (1, 1, H))."""
    emb_p, w_ih_p, w_hh_p, b_ih_p, b_hh_p, w_out_p, b_out_p = packed
    H, V = HIDDEN, VOCAB
    HP = emb_p.shape[1]
    VP = w_out_p.shape[1]
    T = int(tokens.shape[0])

    tokens_i32 = jnp.asarray(tokens, jnp.int32).reshape((T,))
    h_in = jnp.zeros((1, HP), jnp.float32).at[:, :H].set(
        hidden.reshape(1, H).astype(jnp.float32))

    grid_spec = pltpu.PrefetchScalarGridSpec(
        num_scalar_prefetch=1,
        grid=(1,),
        in_specs=[
            pl.BlockSpec((V, HP), lambda i, toks: (0, 0)),        # embedding
            pl.BlockSpec((1, HP), lambda i, toks: (0, 0)),        # h0
            pl.BlockSpec((HP, 3 * HP), lambda i, toks: (0, 0)),   # w_ih (stacked)
            pl.BlockSpec((HP, 3 * HP), lambda i, toks: (0, 0)),   # w_hh (stacked)
            pl.BlockSpec((1, 3 * HP), lambda i, toks: (0, 0)),    # b_ih
            pl.BlockSpec((1, 3 * HP), lambda i, toks: (0, 0)),    # b_hh
            pl.BlockSpec((HP, VP), lambda i, toks: (0, 0)),       # w_out
            pl.BlockSpec((1, VP), lambda i, toks: (0, 0)),        # b_out
        ],
        out_specs=[
            pl.BlockSpec((T, VP), lambda i, toks: (0, 0)),
            pl.BlockSpec((1, HP), lambda i, toks: (0, 0)),
        ],
        scratch_shapes=[
            pltpu.VMEM((T, HP), jnp.float32),        # relu(emb[toks])
            pltpu.VMEM((T, 3 * HP), jnp.float32),    # input-side gate pre-acts
            pltpu.VMEM((T, HP), jnp.float32),        # per-step hidden history
        ],
    )

    logp_p, h_out_p = pl.pallas_call(
        _decoder_kernel,
        out_shape=(jax.ShapeDtypeStruct((T, VP), jnp.float32),
                   jax.ShapeDtypeStruct((1, HP), jnp.float32)),
        grid_spec=grid_spec,
        compiler_params=pltpu.CompilerParams(
            dimension_semantics=("arbitrary",)),
    )(tokens_i32, emb_p, h_in, w_ih_p, w_hh_p, b_ih_p, b_hh_p, w_out_p, b_out_p)

    return logp_p[:, :V], h_out_p[:, :H].reshape(1, 1, H)


def decoder_rnn_step(token, hidden, packed):
    """Single-step form matching the PyTorch module forward signature.

    Prefer decoder_rnn_decode with as many tokens as available: each
    single-step call re-pays dispatch + weight DMA for one tiny GRU step."""
    tokens = jnp.asarray(token, jnp.int32).reshape((1,))
    logp, h_new = decoder_rnn_decode(tokens, hidden, packed)
    return logp, h_new


def init_params(key, hidden_size, output_size):
    """Deterministic synthetic parameters matching PyTorch module layouts."""
    H, V = hidden_size, output_size
    ks = jax.random.split(key, 7)
    k = 1.0 / np.sqrt(H)
    emb = jax.random.normal(ks[0], (V, H), jnp.float32)              # nn.Embedding
    w_ih = jax.random.uniform(ks[1], (3 * H, H), jnp.float32, -k, k)  # weight_ih_l0
    w_hh = jax.random.uniform(ks[2], (3 * H, H), jnp.float32, -k, k)  # weight_hh_l0
    b_ih = jax.random.uniform(ks[3], (3 * H,), jnp.float32, -k, k)
    b_hh = jax.random.uniform(ks[4], (3 * H,), jnp.float32, -k, k)
    w_out = jax.random.uniform(ks[5], (V, H), jnp.float32, -k, k)     # Linear weight
    b_out = jax.random.uniform(ks[6], (V,), jnp.float32, -k, k)
    return (emb, w_ih, w_hh, b_ih, b_hh, w_out, b_out)


def pack_params(raw):
    """Repack PyTorch-layout weights into lane-aligned, gate-stacked kernel layout.

    MXU-feeding matrices (w_ih, w_hh, w_out) are stored in bf16 (f32 accumulate
    in-kernel); biases and the embedding table stay f32."""
    emb, w_ih, w_hh, b_ih, b_hh, w_out, b_out = raw
    V, H = emb.shape
    HP = _round_up(H, LANE)
    VP = _round_up(V, LANE)

    emb_p = jnp.zeros((V, HP), jnp.float32).at[:, :H].set(emb)

    def pack_gate_weights(w):            # w: (3H, H), torch (out, in) layout
        wp = jnp.zeros((HP, 3 * HP), jnp.float32)
        for g in range(3):               # gate order r, z, n
            wg = w[g * H:(g + 1) * H, :].T          # (H, H) so that x @ wg
            wp = wp.at[:H, g * HP:g * HP + H].set(wg)
        return wp.astype(jnp.bfloat16)

    def pack_gate_bias(b):               # b: (3H,)
        bp = jnp.zeros((1, 3 * HP), jnp.float32)
        for g in range(3):
            bp = bp.at[0, g * HP:g * HP + H].set(b[g * H:(g + 1) * H])
        return bp

    w_ih_p = pack_gate_weights(w_ih)
    w_hh_p = pack_gate_weights(w_hh)
    b_ih_p = pack_gate_bias(b_ih)
    b_hh_p = pack_gate_bias(b_hh)

    w_out_p = (jnp.zeros((HP, VP), jnp.float32).at[:H, :V].set(w_out.T)
               .astype(jnp.bfloat16))
    b_out_p = jnp.full((1, VP), NEG_INF, jnp.float32).at[0, :V].set(b_out)

    return (emb_p, w_ih_p, w_hh_p, b_ih_p, b_hh_p, w_out_p, b_out_p)


def reference_decode(tokens, hidden, raw):
    """Pure-JAX f32 reference reproducing the PyTorch forward, looped over T steps."""
    emb, w_ih, w_hh, b_ih, b_hh, w_out, b_out = raw
    H = HIDDEN
    h = hidden.reshape(1, H)
    outs = []
    for t in range(tokens.shape[0]):
        x = jnp.maximum(emb[tokens[t]].reshape(1, H), 0.0)
        gx = x @ w_ih.T + b_ih
        gh = h @ w_hh.T + b_hh
        r = jax.nn.sigmoid(gx[:, :H] + gh[:, :H])
        z = jax.nn.sigmoid(gx[:, H:2 * H] + gh[:, H:2 * H])
        n = jnp.tanh(gx[:, 2 * H:] + r * gh[:, 2 * H:])
        h = (1.0 - z) * n + z * h
        logits = h @ w_out.T + b_out
        outs.append(jax.nn.log_softmax(logits, axis=1))
    return jnp.concatenate(outs, axis=0), h.reshape(1, 1, H)


if __name__ == "__main__":
    key = jax.random.PRNGKey(0)
    pkey, tkey = jax.random.split(key)
    raw = init_params(pkey, HIDDEN, VOCAB)
    packed = pack_params(raw)

    T = 8
    tokens = jax.random.randint(tkey, (T,), 0, VOCAB, jnp.int32)
    hidden0 = jnp.zeros((1, 1, HIDDEN), jnp.float32)       # initHidden()

    # Fused multi-step decode: one pallas_call for all T steps.
    logp, h_final = decoder_rnn_decode(tokens, hidden0, packed)
    jax.block_until_ready((logp, h_final))

    # bf16 matmul weights vs f32 reference -> tolerance loosened accordingly.
    logp_ref, h_ref = reference_decode(tokens, hidden0, raw)
    np.testing.assert_allclose(np.asarray(logp), np.asarray(logp_ref),
                               rtol=5e-2, atol=5e-2)
    np.testing.assert_allclose(np.asarray(h_final), np.asarray(h_ref),
                               rtol=5e-2, atol=5e-2)

    # Single-step form (same signature as the PyTorch module forward).
    logp1, h1 = decoder_rnn_step(tokens[0], hidden0, packed)
    jax.block_until_ready((logp1, h1))
    logp1_ref, h1_ref = reference_decode(tokens[:1], hidden0, raw)
    np.testing.assert_allclose(np.asarray(logp1), np.asarray(logp1_ref),
                               rtol=5e-2, atol=5e-2)
    np.testing.assert_allclose(np.asarray(h1), np.asarray(h1_ref),
                               rtol=5e-2, atol=5e-2)

    # TODO(synk): at production shapes (H=256, translation-scale vocab) tile
    # w_out over a VP grid axis / keep the embedding in HBM and DMA only the T
    # needed rows, per the v7x VMEM-budget notes.
    print("KERNEL_OK")
</pallas_src>

<mosaic_0001>
module attributes {stable_mosaic.version = 11 : i64} {
  func.func @_decoder_kernel(%arg0: i32, %arg1: memref<8xi32, #tpu.memory_space<smem>>, %arg2: memref<64x128xf32, #tpu.memory_space<vmem>>, %arg3: memref<1x128xf32, #tpu.memory_space<vmem>>, %arg4: memref<128x384xbf16, #tpu.memory_space<vmem>>, %arg5: memref<128x384xbf16, #tpu.memory_space<vmem>>, %arg6: memref<1x384xf32, #tpu.memory_space<vmem>>, %arg7: memref<1x384xf32, #tpu.memory_space<vmem>>, %arg8: memref<128x128xbf16, #tpu.memory_space<vmem>>, %arg9: memref<1x128xf32, #tpu.memory_space<vmem>>, %arg10: memref<8x128xf32, #tpu.memory_space<vmem>>, %arg11: memref<1x128xf32, #tpu.memory_space<vmem>>, %arg12: memref<8x128xf32, #tpu.memory_space<vmem>>, %arg13: memref<8x384xf32, #tpu.memory_space<vmem>>, %arg14: memref<8x128xf32, #tpu.memory_space<vmem>>) attributes {dimension_semantics = [#tpu.dimension_semantics<arbitrary>], iteration_bounds = array<i64: 1>, scalar_prefetch = 1 : i64, scratch_operands = 3 : i64, tpu.core_type = #tpu.core_type<tc>, window_params = [{pipeline_mode = #tpu.pipeline_mode<synchronous>, transform_indices = @transform_0, window_bounds = array<i64: 64, 128>}, {pipeline_mode = #tpu.pipeline_mode<synchronous>, transform_indices = @transform_1, window_bounds = array<i64: 1, 128>}, {pipeline_mode = #tpu.pipeline_mode<synchronous>, transform_indices = @transform_2, window_bounds = array<i64: 128, 384>}, {pipeline_mode = #tpu.pipeline_mode<synchronous>, transform_indices = @transform_3, window_bounds = array<i64: 128, 384>}, {pipeline_mode = #tpu.pipeline_mode<synchronous>, transform_indices = @transform_4, window_bounds = array<i64: 1, 384>}, {pipeline_mode = #tpu.pipeline_mode<synchronous>, transform_indices = @transform_5, window_bounds = array<i64: 1, 384>}, {pipeline_mode = #tpu.pipeline_mode<synchronous>, transform_indices = @transform_6, window_bounds = array<i64: 128, 128>}, {pipeline_mode = #tpu.pipeline_mode<synchronous>, transform_indices = @transform_7, window_bounds = array<i64: 1, 128>}, {pipeline_mode = #tpu.pipeline_mode<synchronous>, transform_indices = @transform_8, window_bounds = array<i64: 8, 128>}, {pipeline_mode = #tpu.pipeline_mode<synchronous>, transform_indices = @transform_9, window_bounds = array<i64: 1, 128>}]} {
    %c0 = arith.constant 0 : index
    %0 = memref.load %arg1[%c0] : memref<8xi32, #tpu.memory_space<smem>>
    %1 = arith.index_cast %0 : i32 to index
    %c0_0 = arith.constant 0 : index
    %2 = vector.load %arg2[%1, %c0_0] : memref<64x128xf32, #tpu.memory_space<vmem>>, vector<1x128xf32>
    %cst = arith.constant 0.000000e+00 : f32
    %3 = vector.broadcast %cst : f32 to vector<1x128xf32>
    %4 = arith.maximumf %2, %3 : vector<1x128xf32>
    %c0_1 = arith.constant 0 : index
    %c0_2 = arith.constant 0 : index
    %5 = vector.load %arg12[%c0_1, %c0_2] : memref<8x128xf32, #tpu.memory_space<vmem>>, vector<1x128xf32>
    tpu.vector_store %arg12[%c0_1, %c0_2], %4 {strides = array<i32>} : memref<8x128xf32, #tpu.memory_space<vmem>>, vector<1x128xf32>,
    %c1 = arith.constant 1 : index
    %6 = memref.load %arg1[%c1] : memref<8xi32, #tpu.memory_space<smem>>
    %7 = arith.index_cast %6 : i32 to index
    %c0_3 = arith.constant 0 : index
    %8 = vector.load %arg2[%7, %c0_3] : memref<64x128xf32, #tpu.memory_space<vmem>>, vector<1x128xf32>
    %cst_4 = arith.constant 0.000000e+00 : f32
    %9 = vector.broadcast %cst_4 : f32 to vector<1x128xf32>
    %10 = arith.maximumf %8, %9 : vector<1x128xf32>
    %c1_5 = arith.constant 1 : index
    %c0_6 = arith.constant 0 : index
    %11 = vector.load %arg12[%c1_5, %c0_6] : memref<8x128xf32, #tpu.memory_space<vmem>>, vector<1x128xf32>
    tpu.vector_store %arg12[%c1_5, %c0_6], %10 {strides = array<i32>} : memref<8x128xf32, #tpu.memory_space<vmem>>, vector<1x128xf32>,
    %c2 = arith.constant 2 : index
    %12 = memref.load %arg1[%c2] : memref<8xi32, #tpu.memory_space<smem>>
    %13 = arith.index_cast %12 : i32 to index
    %c0_7 = arith.constant 0 : index
    %14 = vector.load %arg2[%13, %c0_7] : memref<64x128xf32, #tpu.memory_space<vmem>>, vector<1x128xf32>
    %cst_8 = arith.constant 0.000000e+00 : f32
    %15 = vector.broadcast %cst_8 : f32 to vector<1x128xf32>
    %16 = arith.maximumf %14, %15 : vector<1x128xf32>
    %c2_9 = arith.constant 2 : index
    %c0_10 = arith.constant 0 : index
    %17 = vector.load %arg12[%c2_9, %c0_10] : memref<8x128xf32, #tpu.memory_space<vmem>>, vector<1x128xf32>
    tpu.vector_store %arg12[%c2_9, %c0_10], %16 {strides = array<i32>} : memref<8x128xf32, #tpu.memory_space<vmem>>, vector<1x128xf32>,
    %c3 = arith.constant 3 : index
    %18 = memref.load %arg1[%c3] : memref<8xi32, #tpu.memory_space<smem>>
    %19 = arith.index_cast %18 : i32 to index
    %c0_11 = arith.constant 0 : index
    %20 = vector.load %arg2[%19, %c0_11] : memref<64x128xf32, #tpu.memory_space<vmem>>, vector<1x128xf32>
    %cst_12 = arith.constant 0.000000e+00 : f32
    %21 = vector.broadcast %cst_12 : f32 to vector<1x128xf32>
    %22 = arith.maximumf %20, %21 : vector<1x128xf32>
    %c3_13 = arith.constant 3 : index
    %c0_14 = arith.constant 0 : index
    %23 = vector.load %arg12[%c3_13, %c0_14] : memref<8x128xf32, #tpu.memory_space<vmem>>, vector<1x128xf32>
    tpu.vector_store %arg12[%c3_13, %c0_14], %22 {strides = array<i32>} : memref<8x128xf32, #tpu.memory_space<vmem>>, vector<1x128xf32>,
    %c4 = arith.constant 4 : index
    %24 = memref.load %arg1[%c4] : memref<8xi32, #tpu.memory_space<smem>>
    %25 = arith.index_cast %24 : i32 to index
    %c0_15 = arith.constant 0 : index
    %26 = vector.load %arg2[%25, %c0_15] : memref<64x128xf32, #tpu.memory_space<vmem>>, vector<1x128xf32>
    %cst_16 = arith.constant 0.000000e+00 : f32
    %27 = vector.broadcast %cst_16 : f32 to vector<1x128xf32>
    %28 = arith.maximumf %26, %27 : vector<1x128xf32>
    %c4_17 = arith.constant 4 : index
    %c0_18 = arith.constant 0 : index
    %29 = vector.load %arg12[%c4_17, %c0_18] : memref<8x128xf32, #tpu.memory_space<vmem>>, vector<1x128xf32>
    tpu.vector_store %arg12[%c4_17, %c0_18], %28 {strides = array<i32>} : memref<8x128xf32, #tpu.memory_space<vmem>>, vector<1x128xf32>,
    %c5 = arith.constant 5 : index
    %30 = memref.load %arg1[%c5] : memref<8xi32, #tpu.memory_space<smem>>
    %31 = arith.index_cast %30 : i32 to index
    %c0_19 = arith.constant 0 : index
    %32 = vector.load %arg2[%31, %c0_19] : memref<64x128xf32, #tpu.memory_space<vmem>>, vector<1x128xf32>
    %cst_20 = arith.constant 0.000000e+00 : f32
    %33 = vector.broadcast %cst_20 : f32 to vector<1x128xf32>
    %34 = arith.maximumf %32, %33 : vector<1x128xf32>
    %c5_21 = arith.constant 5 : index
    %c0_22 = arith.constant 0 : index
    %35 = vector.load %arg12[%c5_21, %c0_22] : memref<8x128xf32, #tpu.memory_space<vmem>>, vector<1x128xf32>
    tpu.vector_store %arg12[%c5_21, %c0_22], %34 {strides = array<i32>} : memref<8x128xf32, #tpu.memory_space<vmem>>, vector<1x128xf32>,
    %c6 = arith.constant 6 : index
    %36 = memref.load %arg1[%c6] : memref<8xi32, #tpu.memory_space<smem>>
    %37 = arith.index_cast %36 : i32 to index
    %c0_23 = arith.constant 0 : index
    %38 = vector.load %arg2[%37, %c0_23] : memref<64x128xf32, #tpu.memory_space<vmem>>, vector<1x128xf32>
    %cst_24 = arith.constant 0.000000e+00 : f32
    %39 = vector.broadcast %cst_24 : f32 to vector<1x128xf32>
    %40 = arith.maximumf %38, %39 : vector<1x128xf32>
    %c6_25 = arith.constant 6 : index
    %c0_26 = arith.constant 0 : index
    %41 = vector.load %arg12[%c6_25, %c0_26] : memref<8x128xf32, #tpu.memory_space<vmem>>, vector<1x128xf32>
    tpu.vector_store %arg12[%c6_25, %c0_26], %40 {strides = array<i32>} : memref<8x128xf32, #tpu.memory_space<vmem>>, vector<1x128xf32>,
    %c7 = arith.constant 7 : index
    %42 = memref.load %arg1[%c7] : memref<8xi32, #tpu.memory_space<smem>>
    %43 = arith.index_cast %42 : i32 to index
    %c0_27 = arith.constant 0 : index
    %44 = vector.load %arg2[%43, %c0_27] : memref<64x128xf32, #tpu.memory_space<vmem>>, vector<1x128xf32>
    %cst_28 = arith.constant 0.000000e+00 : f32
    %45 = vector.broadcast %cst_28 : f32 to vector<1x128xf32>
    %46 = arith.maximumf %44, %45 : vector<1x128xf32>
    %c7_29 = arith.constant 7 : index
    %c0_30 = arith.constant 0 : index
    %47 = vector.load %arg12[%c7_29, %c0_30] : memref<8x128xf32, #tpu.memory_space<vmem>>, vector<1x128xf32>
    tpu.vector_store %arg12[%c7_29, %c0_30], %46 {strides = array<i32>} : memref<8x128xf32, #tpu.memory_space<vmem>>, vector<1x128xf32>,
    %c0_31 = arith.constant 0 : index
    %c0_32 = arith.constant 0 : index
    %48 = vector.load %arg12[%c0_31, %c0_32] : memref<8x128xf32, #tpu.memory_space<vmem>>, vector<8x128xf32>
    %49 = arith.truncf %48 : vector<8x128xf32> to vector<8x128xbf16>
    %c0_33 = arith.constant 0 : index
    %c0_34 = arith.constant 0 : index
    %50 = vector.load %arg4[%c0_33, %c0_34] : memref<128x384xbf16, #tpu.memory_space<vmem>>, vector<128x384xbf16>
    %cst_35 = arith.constant dense<0.000000e+00> : vector<8x384xf32>
    %51 = tpu.matmul %49, %50, %cst_35 {dimension_numbers = #tpu.dot_dimension_numbers<[1], [0], [0], [1], [0, 0, 1, 1], [], []>} : vector<8x128xbf16>, vector<128x384xbf16>, vector<8x384xf32> -> vector<8x384xf32>
    %c0_36 = arith.constant 0 : index
    %c0_37 = arith.constant 0 : index
    %52 = vector.load %arg6[%c0_36, %c0_37] : memref<1x384xf32, #tpu.memory_space<vmem>>, vector<1x384xf32>
    %53 = vector.broadcast %52 : vector<1x384xf32> to vector<8x384xf32>
    %54 = arith.addf %51, %53 : vector<8x384xf32>
    %c0_38 = arith.constant 0 : index
    %c0_39 = arith.constant 0 : index
    %55 = vector.load %arg13[%c0_38, %c0_39] : memref<8x384xf32, #tpu.memory_space<vmem>>, vector<8x384xf32>
    tpu.vector_store %arg13[%c0_38, %c0_39], %54 {strides = array<i32>} : memref<8x384xf32, #tpu.memory_space<vmem>>, vector<8x384xf32>,
    %c0_40 = arith.constant 0 : index
    %c0_41 = arith.constant 0 : index
    %56 = vector.load %arg5[%c0_40, %c0_41] : memref<128x384xbf16, #tpu.memory_space<vmem>>, vector<128x384xbf16>
    %c0_42 = arith.constant 0 : index
    %c0_43 = arith.constant 0 : index
    %57 = vector.load %arg7[%c0_42, %c0_43] : memref<1x384xf32, #tpu.memory_space<vmem>>, vector<1x384xf32>
    %c0_44 = arith.constant 0 : index
    %c0_45 = arith.constant 0 : index
    %58 = vector.load %arg3[%c0_44, %c0_45] : memref<1x128xf32, #tpu.memory_space<vmem>>, vector<1x128xf32>
    %c0_i32 = arith.constant 0 : i32
    %59 = arith.index_cast %c0_i32 : i32 to index
    %c0_46 = arith.constant 0 : index
    %60 = vector.load %arg13[%59, %c0_46] : memref<8x384xf32, #tpu.memory_space<vmem>>, vector<1x384xf32>
    %61 = arith.truncf %58 : vector<1x128xf32> to vector<1x128xbf16>
    %cst_47 = arith.constant dense<0.000000e+00> : vector<1x384xf32>
    %62 = tpu.matmul %61, %56, %cst_47 {dimension_numbers = #tpu.dot_dimension_numbers<[1], [0], [0], [1], [0, 0, 1, 1], [], []>} : vector<1x128xbf16>, vector<128x384xbf16>, vector<1x384xf32> -> vector<1x384xf32>
    %63 = arith.addf %62, %57 : vector<1x384xf32>
    %64 = vector.extract_strided_slice %60 {offsets = [0, 0], sizes = [1, 128], strides = [1, 1]} : vector<1x384xf32> to vector<1x128xf32>
    %65 = vector.extract_strided_slice %63 {offsets = [0, 0], sizes = [1, 128], strides = [1, 1]} : vector<1x384xf32> to vector<1x128xf32>
    %66 = arith.addf %64, %65 : vector<1x128xf32>
    %67 = arith.negf %66 : vector<1x128xf32>
    %68 = math.exp %67 : vector<1x128xf32>
    %cst_48 = arith.constant 1.000000e+00 : f32
    %69 = vector.broadcast %cst_48 : f32 to vector<1x128xf32>
    %70 = arith.addf %69, %68 : vector<1x128xf32>
    %71 = arith.divf %69, %70 : vector<1x128xf32>
    %72 = vector.extract_strided_slice %60 {offsets = [0, 128], sizes = [1, 128], strides = [1, 1]} : vector<1x384xf32> to vector<1x128xf32>
    %73 = vector.extract_strided_slice %63 {offsets = [0, 128], sizes = [1, 128], strides = [1, 1]} : vector<1x384xf32> to vector<1x128xf32>
    %74 = arith.addf %72, %73 : vector<1x128xf32>
    %75 = arith.negf %74 : vector<1x128xf32>
    %76 = math.exp %75 : vector<1x128xf32>
    %cst_49 = arith.constant 1.000000e+00 : f32
    %77 = vector.broadcast %cst_49 : f32 to vector<1x128xf32>
    %78 = arith.addf %77, %76 : vector<1x128xf32>
    %79 = arith.divf %77, %78 : vector<1x128xf32>
    %80 = vector.extract_strided_slice %60 {offsets = [0, 256], sizes = [1, 128], strides = [1, 1]} : vector<1x384xf32> to vector<1x128xf32>
    %81 = vector.extract_strided_slice %63 {offsets = [0, 256], sizes = [1, 128], strides = [1, 1]} : vector<1x384xf32> to vector<1x128xf32>
    %82 = arith.mulf %71, %81 : vector<1x128xf32>
    %83 = arith.addf %80, %82 : vector<1x128xf32>
    %84 = math.tanh %83 : vector<1x128xf32>
    %cst_50 = arith.constant 1.000000e+00 : f32
    %85 = vector.broadcast %cst_50 : f32 to vector<1x128xf32>
    %86 = arith.subf %85, %79 : vector<1x128xf32>
    %87 = arith.mulf %86, %84 : vector<1x128xf32>
    %88 = arith.mulf %79, %58 : vector<1x128xf32>
    %89 = arith.addf %87, %88 : vector<1x128xf32>
    %90 = arith.index_cast %c0_i32 : i32 to index
    %c0_51 = arith.constant 0 : index
    %91 = vector.load %arg14[%90, %c0_51] : memref<8x128xf32, #tpu.memory_space<vmem>>, vector<1x128xf32>
    tpu.vector_store %arg14[%90, %c0_51], %89 {strides = array<i32>} : memref<8x128xf32, #tpu.memory_space<vmem>>, vector<1x128xf32>,
    %c1_i32 = arith.constant 1 : i32
    %92 = arith.index_cast %c1_i32 : i32 to index
    %c0_52 = arith.constant 0 : index
    %93 = vector.load %arg13[%92, %c0_52] : memref<8x384xf32, #tpu.memory_space<vmem>>, vector<1x384xf32>
    %94 = arith.truncf %89 : vector<1x128xf32> to vector<1x128xbf16>
    %cst_53 = arith.constant dense<0.000000e+00> : vector<1x384xf32>
    %95 = tpu.matmul %94, %56, %cst_53 {dimension_numbers = #tpu.dot_dimension_numbers<[1], [0], [0], [1], [0, 0, 1, 1], [], []>} : vector<1x128xbf16>, vector<128x384xbf16>, vector<1x384xf32> -> vector<1x384xf32>
    %96 = arith.addf %95, %57 : vector<1x384xf32>
    %97 = vector.extract_strided_slice %93 {offsets = [0, 0], sizes = [1, 128], strides = [1, 1]} : vector<1x384xf32> to vector<1x128xf32>
    %98 = vector.extract_strided_slice %96 {offsets = [0, 0], sizes = [1, 128], strides = [1, 1]} : vector<1x384xf32> to vector<1x128xf32>
    %99 = arith.addf %97, %98 : vector<1x128xf32>
    %100 = arith.negf %99 : vector<1x128xf32>
    %101 = math.exp %100 : vector<1x128xf32>
    %cst_54 = arith.constant 1.000000e+00 : f32
    %102 = vector.broadcast %cst_54 : f32 to vector<1x128xf32>
    %103 = arith.addf %102, %101 : vector<1x128xf32>
    %104 = arith.divf %102, %103 : vector<1x128xf32>
    %105 = vector.extract_strided_slice %93 {offsets = [0, 128], sizes = [1, 128], strides = [1, 1]} : vector<1x384xf32> to vector<1x128xf32>
    %106 = vector.extract_strided_slice %96 {offsets = [0, 128], sizes = [1, 128], strides = [1, 1]} : vector<1x384xf32> to vector<1x128xf32>
    %107 = arith.addf %105, %106 : vector<1x128xf32>
    %108 = arith.negf %107 : vector<1x128xf32>
    %109 = math.exp %108 : vector<1x128xf32>
    %cst_55 = arith.constant 1.000000e+00 : f32
    %110 = vector.broadcast %cst_55 : f32 to vector<1x128xf32>
    %111 = arith.addf %110, %109 : vector<1x128xf32>
    %112 = arith.divf %110, %111 : vector<1x128xf32>
    %113 = vector.extract_strided_slice %93 {offsets = [0, 256], sizes = [1, 128], strides = [1, 1]} : vector<1x384xf32> to vector<1x128xf32>
    %114 = vector.extract_strided_slice %96 {offsets = [0, 256], sizes = [1, 128], strides = [1, 1]} : vector<1x384xf32> to vector<1x128xf32>
    %115 = arith.mulf %104, %114 : vector<1x128xf32>
    %116 = arith.addf %113, %115 : vector<1x128xf32>
    %117 = math.tanh %116 : vector<1x128xf32>
    %cst_56 = arith.constant 1.000000e+00 : f32
    %118 = vector.broadcast %cst_56 : f32 to vector<1x128xf32>
    %119 = arith.subf %118, %112 : vector<1x128xf32>
    %120 = arith.mulf %119, %117 : vector<1x128xf32>
    %121 = arith.mulf %112, %89 : vector<1x128xf32>
    %122 = arith.addf %120, %121 : vector<1x128xf32>
    %123 = arith.index_cast %c1_i32 : i32 to index
    %c0_57 = arith.constant 0 : index
    %124 = vector.load %arg14[%123, %c0_57] : memref<8x128xf32, #tpu.memory_space<vmem>>, vector<1x128xf32>
    tpu.vector_store %arg14[%123, %c0_57], %122 {strides = array<i32>} : memref<8x128xf32, #tpu.memory_space<vmem>>, vector<1x128xf32>,
    %c2_i32 = arith.constant 2 : i32
    %125 = arith.index_cast %c2_i32 : i32 to index
    %c0_58 = arith.constant 0 : index
    %126 = vector.load %arg13[%125, %c0_58] : memref<8x384xf32, #tpu.memory_space<vmem>>, vector<1x384xf32>
    %127 = arith.truncf %122 : vector<1x128xf32> to vector<1x128xbf16>
    %cst_59 = arith.constant dense<0.000000e+00> : vector<1x384xf32>
    %128 = tpu.matmul %127, %56, %cst_59 {dimension_numbers = #tpu.dot_dimension_numbers<[1], [0], [0], [1], [0, 0, 1, 1], [], []>} : vector<1x128xbf16>, vector<128x384xbf16>, vector<1x384xf32> -> vector<1x384xf32>
    %129 = arith.addf %128, %57 : vector<1x384xf32>
    %130 = vector.extract_strided_slice %126 {offsets = [0, 0], sizes = [1, 128], strides = [1, 1]} : vector<1x384xf32> to vector<1x128xf32>
    %131 = vector.extract_strided_slice %129 {offsets = [0, 0], sizes = [1, 128], strides = [1, 1]} : vector<1x384xf32> to vector<1x128xf32>
    %132 = arith.addf %130, %131 : vector<1x128xf32>
    %133 = arith.negf %132 : vector<1x128xf32>
    %134 = math.exp %133 : vector<1x128xf32>
    %cst_60 = arith.constant 1.000000e+00 : f32
    %135 = vector.broadcast %cst_60 : f32 to vector<1x128xf32>
    %136 = arith.addf %135, %134 : vector<1x128xf32>
    %137 = arith.divf %135, %136 : vector<1x128xf32>
    %138 = vector.extract_strided_slice %126 {offsets = [0, 128], sizes = [1, 128], strides = [1, 1]} : vector<1x384xf32> to vector<1x128xf32>
    %139 = vector.extract_strided_slice %129 {offsets = [0, 128], sizes = [1, 128], strides = [1, 1]} : vector<1x384xf32> to vector<1x128xf32>
    %140 = arith.addf %138, %139 : vector<1x128xf32>
    %141 = arith.negf %140 : vector<1x128xf32>
    %142 = math.exp %141 : vector<1x128xf32>
    %cst_61 = arith.constant 1.000000e+00 : f32
    %143 = vector.broadcast %cst_61 : f32 to vector<1x128xf32>
    %144 = arith.addf %143, %142 : vector<1x128xf32>
    %145 = arith.divf %143, %144 : vector<1x128xf32>
    %146 = vector.extract_strided_slice %126 {offsets = [0, 256], sizes = [1, 128], strides = [1, 1]} : vector<1x384xf32> to vector<1x128xf32>
    %147 = vector.extract_strided_slice %129 {offsets = [0, 256], sizes = [1, 128], strides = [1, 1]} : vector<1x384xf32> to vector<1x128xf32>
    %148 = arith.mulf %137, %147 : vector<1x128xf32>
    %149 = arith.addf %146, %148 : vector<1x128xf32>
    %150 = math.tanh %149 : vector<1x128xf32>
    %cst_62 = arith.constant 1.000000e+00 : f32
    %151 = vector.broadcast %cst_62 : f32 to vector<1x128xf32>
    %152 = arith.subf %151, %145 : vector<1x128xf32>
    %153 = arith.mulf %152, %150 : vector<1x128xf32>
    %154 = arith.mulf %145, %122 : vector<1x128xf32>
    %155 = arith.addf %153, %154 : vector<1x128xf32>
    %156 = arith.index_cast %c2_i32 : i32 to index
    %c0_63 = arith.constant 0 : index
    %157 = vector.load %arg14[%156, %c0_63] : memref<8x128xf32, #tpu.memory_space<vmem>>, vector<1x128xf32>
    tpu.vector_store %arg14[%156, %c0_63], %155 {strides = array<i32>} : memref<8x128xf32, #tpu.memory_space<vmem>>, vector<1x128xf32>,
    %c3_i32 = arith.constant 3 : i32
    %158 = arith.index_cast %c3_i32 : i32 to index
    %c0_64 = arith.constant 0 : index
    %159 = vector.load %arg13[%158, %c0_64] : memref<8x384xf32, #tpu.memory_space<vmem>>, vector<1x384xf32>
    %160 = arith.truncf %155 : vector<1x128xf32> to vector<1x128xbf16>
    %cst_65 = arith.constant dense<0.000000e+00> : vector<1x384xf32>
    %161 = tpu.matmul %160, %56, %cst_65 {dimension_numbers = #tpu.dot_dimension_numbers<[1], [0], [0], [1], [0, 0, 1, 1], [], []>} : vector<1x128xbf16>, vector<128x384xbf16>, vector<1x384xf32> -> vector<1x384xf32>
    %162 = arith.addf %161, %57 : vector<1x384xf32>
    %163 = vector.extract_strided_slice %159 {offsets = [0, 0], sizes = [1, 128], strides = [1, 1]} : vector<1x384xf32> to vector<1x128xf32>
    %164 = vector.extract_strided_slice %162 {offsets = [0, 0], sizes = [1, 128], strides = [1, 1]} : vector<1x384xf32> to vector<1x128xf32>
    %165 = arith.addf %163, %164 : vector<1x128xf32>
    %166 = arith.negf %165 : vector<1x128xf32>
    %167 = math.exp %166 : vector<1x128xf32>
    %cst_66 = arith.constant 1.000000e+00 : f32
    %168 = vector.broadcast %cst_66 : f32 to vector<1x128xf32>
    %169 = arith.addf %168, %167 : vector<1x128xf32>
    %170 = arith.divf %168, %169 : vector<1x128xf32>
    %171 = vector.extract_strided_slice %159 {offsets = [0, 128], sizes = [1, 128], strides = [1, 1]} : vector<1x384xf32> to vector<1x128xf32>
    %172 = vector.extract_strided_slice %162 {offsets = [0, 128], sizes = [1, 128], strides = [1, 1]} : vector<1x384xf32> to vector<1x128xf32>
    %173 = arith.addf %171, %172 : vector<1x128xf32>
    %174 = arith.negf %173 : vector<1x128xf32>
    %175 = math.exp %174 : vector<1x128xf32>
    %cst_67 = arith.constant 1.000000e+00 : f32
    %176 = vector.broadcast %cst_67 : f32 to vector<1x128xf32>
    %177 = arith.addf %176, %175 : vector<1x128xf32>
    %178 = arith.divf %176, %177 : vector<1x128xf32>
    %179 = vector.extract_strided_slice %159 {offsets = [0, 256], sizes = [1, 128], strides = [1, 1]} : vector<1x384xf32> to vector<1x128xf32>
    %180 = vector.extract_strided_slice %162 {offsets = [0, 256], sizes = [1, 128], strides = [1, 1]} : vector<1x384xf32> to vector<1x128xf32>
    %181 = arith.mulf %170, %180 : vector<1x128xf32>
    %182 = arith.addf %179, %181 : vector<1x128xf32>
    %183 = math.tanh %182 : vector<1x128xf32>
    %cst_68 = arith.constant 1.000000e+00 : f32
    %184 = vector.broadcast %cst_68 : f32 to vector<1x128xf32>
    %185 = arith.subf %184, %178 : vector<1x128xf32>
    %186 = arith.mulf %185, %183 : vector<1x128xf32>
    %187 = arith.mulf %178, %155 : vector<1x128xf32>
    %188 = arith.addf %186, %187 : vector<1x128xf32>
    %189 = arith.index_cast %c3_i32 : i32 to index
    %c0_69 = arith.constant 0 : index
    %190 = vector.load %arg14[%189, %c0_69] : memref<8x128xf32, #tpu.memory_space<vmem>>, vector<1x128xf32>
    tpu.vector_store %arg14[%189, %c0_69], %188 {strides = array<i32>} : memref<8x128xf32, #tpu.memory_space<vmem>>, vector<1x128xf32>,
    %c4_i32 = arith.constant 4 : i32
    %191 = arith.index_cast %c4_i32 : i32 to index
    %c0_70 = arith.constant 0 : index
    %192 = vector.load %arg13[%191, %c0_70] : memref<8x384xf32, #tpu.memory_space<vmem>>, vector<1x384xf32>
    %193 = arith.truncf %188 : vector<1x128xf32> to vector<1x128xbf16>
    %cst_71 = arith.constant dense<0.000000e+00> : vector<1x384xf32>
    %194 = tpu.matmul %193, %56, %cst_71 {dimension_numbers = #tpu.dot_dimension_numbers<[1], [0], [0], [1], [0, 0, 1, 1], [], []>} : vector<1x128xbf16>, vector<128x384xbf16>, vector<1x384xf32> -> vector<1x384xf32>
    %195 = arith.addf %194, %57 : vector<1x384xf32>
    %196 = vector.extract_strided_slice %192 {offsets = [0, 0], sizes = [1, 128], strides = [1, 1]} : vector<1x384xf32> to vector<1x128xf32>
    %197 = vector.extract_strided_slice %195 {offsets = [0, 0], sizes = [1, 128], strides = [1, 1]} : vector<1x384xf32> to vector<1x128xf32>
    %198 = arith.addf %196, %197 : vector<1x128xf32>
    %199 = arith.negf %198 : vector<1x128xf32>
    %200 = math.exp %199 : vector<1x128xf32>
    %cst_72 = arith.constant 1.000000e+00 : f32
    %201 = vector.broadcast %cst_72 : f32 to vector<1x128xf32>
    %202 = arith.addf %201, %200 : vector<1x128xf32>
    %203 = arith.divf %201, %202 : vector<1x128xf32>
    %204 = vector.extract_strided_slice %192 {offsets = [0, 128], sizes = [1, 128], strides = [1, 1]} : vector<1x384xf32> to vector<1x128xf32>
    %205 = vector.extract_strided_slice %195 {offsets = [0, 128], sizes = [1, 128], strides = [1, 1]} : vector<1x384xf32> to vector<1x128xf32>
    %206 = arith.addf %204, %205 : vector<1x128xf32>
    %207 = arith.negf %206 : vector<1x128xf32>
    %208 = math.exp %207 : vector<1x128xf32>
    %cst_73 = arith.constant 1.000000e+00 : f32
    %209 = vector.broadcast %cst_73 : f32 to vector<1x128xf32>
    %210 = arith.addf %209, %208 : vector<1x128xf32>
    %211 = arith.divf %209, %210 : vector<1x128xf32>
    %212 = vector.extract_strided_slice %192 {offsets = [0, 256], sizes = [1, 128], strides = [1, 1]} : vector<1x384xf32> to vector<1x128xf32>
    %213 = vector.extract_strided_slice %195 {offsets = [0, 256], sizes = [1, 128], strides = [1, 1]} : vector<1x384xf32> to vector<1x128xf32>
    %214 = arith.mulf %203, %213 : vector<1x128xf32>
    %215 = arith.addf %212, %214 : vector<1x128xf32>
    %216 = math.tanh %215 : vector<1x128xf32>
    %cst_74 = arith.constant 1.000000e+00 : f32
    %217 = vector.broadcast %cst_74 : f32 to vector<1x128xf32>
    %218 = arith.subf %217, %211 : vector<1x128xf32>
    %219 = arith.mulf %218, %216 : vector<1x128xf32>
    %220 = arith.mulf %211, %188 : vector<1x128xf32>
    %221 = arith.addf %219, %220 : vector<1x128xf32>
    %222 = arith.index_cast %c4_i32 : i32 to index
    %c0_75 = arith.constant 0 : index
    %223 = vector.load %arg14[%222, %c0_75] : memref<8x128xf32, #tpu.memory_space<vmem>>, vector<1x128xf32>
    tpu.vector_store %arg14[%222, %c0_75], %221 {strides = array<i32>} : memref<8x128xf32, #tpu.memory_space<vmem>>, vector<1x128xf32>,
    %c5_i32 = arith.constant 5 : i32
    %224 = arith.index_cast %c5_i32 : i32 to index
    %c0_76 = arith.constant 0 : index
    %225 = vector.load %arg13[%224, %c0_76] : memref<8x384xf32, #tpu.memory_space<vmem>>, vector<1x384xf32>
    %226 = arith.truncf %221 : vector<1x128xf32> to vector<1x128xbf16>
    %cst_77 = arith.constant dense<0.000000e+00> : vector<1x384xf32>
    %227 = tpu.matmul %226, %56, %cst_77 {dimension_numbers = #tpu.dot_dimension_numbers<[1], [0], [0], [1], [0, 0, 1, 1], [], []>} : vector<1x128xbf16>, vector<128x384xbf16>, vector<1x384xf32> -> vector<1x384xf32>
    %228 = arith.addf %227, %57 : vector<1x384xf32>
    %229 = vector.extract_strided_slice %225 {offsets = [0, 0], sizes = [1, 128], strides = [1, 1]} : vector<1x384xf32> to vector<1x128xf32>
    %230 = vector.extract_strided_slice %228 {offsets = [0, 0], sizes = [1, 128], strides = [1, 1]} : vector<1x384xf32> to vector<1x128xf32>
    %231 = arith.addf %229, %230 : vector<1x128xf32>
    %232 = arith.negf %231 : vector<1x128xf32>
    %233 = math.exp %232 : vector<1x128xf32>
    %cst_78 = arith.constant 1.000000e+00 : f32
    %234 = vector.broadcast %cst_78 : f32 to vector<1x128xf32>
    %235 = arith.addf %234, %233 : vector<1x128xf32>
    %236 = arith.divf %234, %235 : vector<1x128xf32>
    %237 = vector.extract_strided_slice %225 {offsets = [0, 128], sizes = [1, 128], strides = [1, 1]} : vector<1x384xf32> to vector<1x128xf32>
    %238 = vector.extract_strided_slice %228 {offsets = [0, 128], sizes = [1, 128], strides = [1, 1]} : vector<1x384xf32> to vector<1x128xf32>
    %239 = arith.addf %237, %238 : vector<1x128xf32>
    %240 = arith.negf %239 : vector<1x128xf32>
    %241 = math.exp %240 : vector<1x128xf32>
    %cst_79 = arith.constant 1.000000e+00 : f32
    %242 = vector.broadcast %cst_79 : f32 to vector<1x128xf32>
    %243 = arith.addf %242, %241 : vector<1x128xf32>
    %244 = arith.divf %242, %243 : vector<1x128xf32>
    %245 = vector.extract_strided_slice %225 {offsets = [0, 256], sizes = [1, 128], strides = [1, 1]} : vector<1x384xf32> to vector<1x128xf32>
    %246 = vector.extract_strided_slice %228 {offsets = [0, 256], sizes = [1, 128], strides = [1, 1]} : vector<1x384xf32> to vector<1x128xf32>
    %247 = arith.mulf %236, %246 : vector<1x128xf32>
    %248 = arith.addf %245, %247 : vector<1x128xf32>
    %249 = math.tanh %248 : vector<1x128xf32>
    %cst_80 = arith.constant 1.000000e+00 : f32
    %250 = vector.broadcast %cst_80 : f32 to vector<1x128xf32>
    %251 = arith.subf %250, %244 : vector<1x128xf32>
    %252 = arith.mulf %251, %249 : vector<1x128xf32>
    %253 = arith.mulf %244, %221 : vector<1x128xf32>
    %254 = arith.addf %252, %253 : vector<1x128xf32>
    %255 = arith.index_cast %c5_i32 : i32 to index
    %c0_81 = arith.constant 0 : index
    %256 = vector.load %arg14[%255, %c0_81] : memref<8x128xf32, #tpu.memory_space<vmem>>, vector<1x128xf32>
    tpu.vector_store %arg14[%255, %c0_81], %254 {strides = array<i32>} : memref<8x128xf32, #tpu.memory_space<vmem>>, vector<1x128xf32>,
    %c6_i32 = arith.constant 6 : i32
    %257 = arith.index_cast %c6_i32 : i32 to index
    %c0_82 = arith.constant 0 : index
    %258 = vector.load %arg13[%257, %c0_82] : memref<8x384xf32, #tpu.memory_space<vmem>>, vector<1x384xf32>
    %259 = arith.truncf %254 : vector<1x128xf32> to vector<1x128xbf16>
    %cst_83 = arith.constant dense<0.000000e+00> : vector<1x384xf32>
    %260 = tpu.matmul %259, %56, %cst_83 {dimension_numbers = #tpu.dot_dimension_numbers<[1], [0], [0], [1], [0, 0, 1, 1], [], []>} : vector<1x128xbf16>, vector<128x384xbf16>, vector<1x384xf32> -> vector<1x384xf32>
    %261 = arith.addf %260, %57 : vector<1x384xf32>
    %262 = vector.extract_strided_slice %258 {offsets = [0, 0], sizes = [1, 128], strides = [1, 1]} : vector<1x384xf32> to vector<1x128xf32>
    %263 = vector.extract_strided_slice %261 {offsets = [0, 0], sizes = [1, 128], strides = [1, 1]} : vector<1x384xf32> to vector<1x128xf32>
    %264 = arith.addf %262, %263 : vector<1x128xf32>
    %265 = arith.negf %264 : vector<1x128xf32>
    %266 = math.exp %265 : vector<1x128xf32>
    %cst_84 = arith.constant 1.000000e+00 : f32
    %267 = vector.broadcast %cst_84 : f32 to vector<1x128xf32>
    %268 = arith.addf %267, %266 : vector<1x128xf32>
    %269 = arith.divf %267, %268 : vector<1x128xf32>
    %270 = vector.extract_strided_slice %258 {offsets = [0, 128], sizes = [1, 128], strides = [1, 1]} : vector<1x384xf32> to vector<1x128xf32>
    %271 = vector.extract_strided_slice %261 {offsets = [0, 128], sizes = [1, 128], strides = [1, 1]} : vector<1x384xf32> to vector<1x128xf32>
    %272 = arith.addf %270, %271 : vector<1x128xf32>
    %273 = arith.negf %272 : vector<1x128xf32>
    %274 = math.exp %273 : vector<1x128xf32>
    %cst_85 = arith.constant 1.000000e+00 : f32
    %275 = vector.broadcast %cst_85 : f32 to vector<1x128xf32>
    %276 = arith.addf %275, %274 : vector<1x128xf32>
    %277 = arith.divf %275, %276 : vector<1x128xf32>
    %278 = vector.extract_strided_slice %258 {offsets = [0, 256], sizes = [1, 128], strides = [1, 1]} : vector<1x384xf32> to vector<1x128xf32>
    %279 = vector.extract_strided_slice %261 {offsets = [0, 256], sizes = [1, 128], strides = [1, 1]} : vector<1x384xf32> to vector<1x128xf32>
    %280 = arith.mulf %269, %279 : vector<1x128xf32>
    %281 = arith.addf %278, %280 : vector<1x128xf32>
    %282 = math.tanh %281 : vector<1x128xf32>
    %cst_86 = arith.constant 1.000000e+00 : f32
    %283 = vector.broadcast %cst_86 : f32 to vector<1x128xf32>
    %284 = arith.subf %283, %277 : vector<1x128xf32>
    %285 = arith.mulf %284, %282 : vector<1x128xf32>
    %286 = arith.mulf %277, %254 : vector<1x128xf32>
    %287 = arith.addf %285, %286 : vector<1x128xf32>
    %288 = arith.index_cast %c6_i32 : i32 to index
    %c0_87 = arith.constant 0 : index
    %289 = vector.load %arg14[%288, %c0_87] : memref<8x128xf32, #tpu.memory_space<vmem>>, vector<1x128xf32>
    tpu.vector_store %arg14[%288, %c0_87], %287 {strides = array<i32>} : memref<8x128xf32, #tpu.memory_space<vmem>>, vector<1x128xf32>,
    %c7_i32 = arith.constant 7 : i32
    %290 = arith.index_cast %c7_i32 : i32 to index
    %c0_88 = arith.constant 0 : index
    %291 = vector.load %arg13[%290, %c0_88] : memref<8x384xf32, #tpu.memory_space<vmem>>, vector<1x384xf32>
    %292 = arith.truncf %287 : vector<1x128xf32> to vector<1x128xbf16>
    %cst_89 = arith.constant dense<0.000000e+00> : vector<1x384xf32>
    %293 = tpu.matmul %292, %56, %cst_89 {dimension_numbers = #tpu.dot_dimension_numbers<[1], [0], [0], [1], [0, 0, 1, 1], [], []>} : vector<1x128xbf16>, vector<128x384xbf16>, vector<1x384xf32> -> vector<1x384xf32>
    %294 = arith.addf %293, %57 : vector<1x384xf32>
    %295 = vector.extract_strided_slice %291 {offsets = [0, 0], sizes = [1, 128], strides = [1, 1]} : vector<1x384xf32> to vector<1x128xf32>
    %296 = vector.extract_strided_slice %294 {offsets = [0, 0], sizes = [1, 128], strides = [1, 1]} : vector<1x384xf32> to vector<1x128xf32>
    %297 = arith.addf %295, %296 : vector<1x128xf32>
    %298 = arith.negf %297 : vector<1x128xf32>
    %299 = math.exp %298 : vector<1x128xf32>
    %cst_90 = arith.constant 1.000000e+00 : f32
    %300 = vector.broadcast %cst_90 : f32 to vector<1x128xf32>
    %301 = arith.addf %300, %299 : vector<1x128xf32>
    %302 = arith.divf %300, %301 : vector<1x128xf32>
    %303 = vector.extract_strided_slice %291 {offsets = [0, 128], sizes = [1, 128], strides = [1, 1]} : vector<1x384xf32> to vector<1x128xf32>
    %304 = vector.extract_strided_slice %294 {offsets = [0, 128], sizes = [1, 128], strides = [1, 1]} : vector<1x384xf32> to vector<1x128xf32>
    %305 = arith.addf %303, %304 : vector<1x128xf32>
    %306 = arith.negf %305 : vector<1x128xf32>
    %307 = math.exp %306 : vector<1x128xf32>
    %cst_91 = arith.constant 1.000000e+00 : f32
    %308 = vector.broadcast %cst_91 : f32 to vector<1x128xf32>
    %309 = arith.addf %308, %307 : vector<1x128xf32>
    %310 = arith.divf %308, %309 : vector<1x128xf32>
    %311 = vector.extract_strided_slice %291 {offsets = [0, 256], sizes = [1, 128], strides = [1, 1]} : vector<1x384xf32> to vector<1x128xf32>
    %312 = vector.extract_strided_slice %294 {offsets = [0, 256], sizes = [1, 128], strides = [1, 1]} : vector<1x384xf32> to vector<1x128xf32>
    %313 = arith.mulf %302, %312 : vector<1x128xf32>
    %314 = arith.addf %311, %313 : vector<1x128xf32>
    %315 = math.tanh %314 : vector<1x128xf32>
    %cst_92 = arith.constant 1.000000e+00 : f32
    %316 = vector.broadcast %cst_92 : f32 to vector<1x128xf32>
    %317 = arith.subf %316, %310 : vector<1x128xf32>
    %318 = arith.mulf %317, %315 : vector<1x128xf32>
    %319 = arith.mulf %310, %287 : vector<1x128xf32>
    %320 = arith.addf %318, %319 : vector<1x128xf32>
    %321 = arith.index_cast %c7_i32 : i32 to index
    %c0_93 = arith.constant 0 : index
    %322 = vector.load %arg14[%321, %c0_93] : memref<8x128xf32, #tpu.memory_space<vmem>>, vector<1x128xf32>
    tpu.vector_store %arg14[%321, %c0_93], %320 {strides = array<i32>} : memref<8x128xf32, #tpu.memory_space<vmem>>, vector<1x128xf32>,
    %c8_i32 = arith.constant 8 : i32
    %c0_94 = arith.constant 0 : index
    %c0_95 = arith.constant 0 : index
    %323 = vector.load %arg11[%c0_94, %c0_95] : memref<1x128xf32, #tpu.memory_space<vmem>>, vector<1x128xf32>
    tpu.vector_store %arg11[%c0_94, %c0_95], %320 {strides = array<i32>} : memref<1x128xf32, #tpu.memory_space<vmem>>, vector<1x128xf32>,
    %c0_96 = arith.constant 0 : index
    %c0_97 = arith.constant 0 : index
    %324 = vector.load %arg14[%c0_96, %c0_97] : memref<8x128xf32, #tpu.memory_space<vmem>>, vector<8x128xf32>
    %325 = arith.truncf %324 : vector<8x128xf32> to vector<8x128xbf16>
    %c0_98 = arith.constant 0 : index
    %c0_99 = arith.constant 0 : index
    %326 = vector.load %arg8[%c0_98, %c0_99] : memref<128x128xbf16, #tpu.memory_space<vmem>>, vector<128x128xbf16>
    %cst_100 = arith.constant dense<0.000000e+00> : vector<8x128xf32>
    %327 = tpu.matmul %325, %326, %cst_100 {dimension_numbers = #tpu.dot_dimension_numbers<[1], [0], [0], [1], [0, 0, 1, 1], [], []>} : vector<8x128xbf16>, vector<128x128xbf16>, vector<8x128xf32> -> vector<8x128xf32>
    %c0_101 = arith.constant 0 : index
    %c0_102 = arith.constant 0 : index
    %328 = vector.load %arg9[%c0_101, %c0_102] : memref<1x128xf32, #tpu.memory_space<vmem>>, vector<1x128xf32>
    %329 = vector.broadcast %328 : vector<1x128xf32> to vector<8x128xf32>
    %330 = arith.addf %327, %329 : vector<8x128xf32>
    %cst_103 = arith.constant dense<0xFF800000> : vector<8xf32>
    %331 = vector.multi_reduction <maximumf>, %330, %cst_103 [1] : vector<8x128xf32> to vector<8xf32>
    %332 = vector.shape_cast %331 : vector<8xf32> to vector<8x1xf32>
    %333 = vector.broadcast %332 : vector<8x1xf32> to vector<8x128xf32>
    %334 = arith.subf %330, %333 : vector<8x128xf32>
    %335 = math.exp %334 : vector<8x128xf32>
    %cst_104 = arith.constant dense<0.000000e+00> : vector<8xf32>
    %336 = vector.multi_reduction <add>, %335, %cst_104 [1] : vector<8x128xf32> to vector<8xf32>
    %337 = vector.shape_cast %336 : vector<8xf32> to vector<8x1xf32>
    %338 = math.log %337 : vector<8x1xf32>
    %339 = vector.broadcast %338 : vector<8x1xf32> to vector<8x128xf32>
    %340 = arith.subf %334, %339 : vector<8x128xf32>
    %c0_105 = arith.constant 0 : index
    %c0_106 = arith.constant 0 : index
    %341 = vector.load %arg10[%c0_105, %c0_106] : memref<8x128xf32, #tpu.memory_space<vmem>>, vector<8x128xf32>
    tpu.vector_store %arg10[%c0_105, %c0_106], %340 {strides = array<i32>} : memref<8x128xf32, #tpu.memory_space<vmem>>, vector<8x128xf32>,
    return
  }
  func.func @transform_0(%arg0: i32, %arg1: memref<8xi32, #tpu.memory_space<smem>>) -> (i32, i32) {
    %c0_i32 = arith.constant 0 : i32
    %c0_i32_0 = arith.constant 0 : i32
    %c0_i32_1 = arith.constant 0 : i32
    return %c0_i32, %c0_i32_0 : i32, i32
  }
  func.func @transform_1(%arg0: i32, %arg1: memref<8xi32, #tpu.memory_space<smem>>) -> (i32, i32) {
    %c0_i32 = arith.constant 0 : i32
    %c0_i32_0 = arith.constant 0 : i32
    %c0_i32_1 = arith.constant 0 : i32
    return %c0_i32, %c0_i32_0 : i32, i32
  }
  func.func @transform_2(%arg0: i32, %arg1: memref<8xi32, #tpu.memory_space<smem>>) -> (i32, i32) {
    %c0_i32 = arith.constant 0 : i32
    %c0_i32_0 = arith.constant 0 : i32
    %c0_i32_1 = arith.constant 0 : i32
    return %c0_i32, %c0_i32_0 : i32, i32
  }
  func.func @transform_3(%arg0: i32, %arg1: memref<8xi32, #tpu.memory_space<smem>>) -> (i32, i32) {
    %c0_i32 = arith.constant 0 : i32
    %c0_i32_0 = arith.constant 0 : i32
    %c0_i32_1 = arith.constant 0 : i32
    return %c0_i32, %c0_i32_0 : i32, i32
  }
  func.func @transform_4(%arg0: i32, %arg1: memref<8xi32, #tpu.memory_space<smem>>) -> (i32, i32) {
    %c0_i32 = arith.constant 0 : i32
    %c0_i32_0 = arith.constant 0 : i32
    %c0_i32_1 = arith.constant 0 : i32
    return %c0_i32, %c0_i32_0 : i32, i32
  }
  func.func @transform_5(%arg0: i32, %arg1: memref<8xi32, #tpu.memory_space<smem>>) -> (i32, i32) {
    %c0_i32 = arith.constant 0 : i32
    %c0_i32_0 = arith.constant 0 : i32
    %c0_i32_1 = arith.constant 0 : i32
    return %c0_i32, %c0_i32_0 : i32, i32
  }
  func.func @transform_6(%arg0: i32, %arg1: memref<8xi32, #tpu.memory_space<smem>>) -> (i32, i32) {
    %c0_i32 = arith.constant 0 : i32
    %c0_i32_0 = arith.constant 0 : i32
    %c0_i32_1 = arith.constant 0 : i32
    return %c0_i32, %c0_i32_0 : i32, i32
  }
  func.func @transform_7(%arg0: i32, %arg1: memref<8xi32, #tpu.memory_space<smem>>) -> (i32, i32) {
    %c0_i32 = arith.constant 0 : i32
    %c0_i32_0 = arith.constant 0 : i32
    %c0_i32_1 = arith.constant 0 : i32
    return %c0_i32, %c0_i32_0 : i32, i32
  }
  func.func @transform_8(%arg0: i32, %arg1: memref<8xi32, #tpu.memory_space<smem>>) -> (i32, i32) {
    %c0_i32 = arith.constant 0 : i32
    %c0_i32_0 = arith.constant 0 : i32
    %c0_i32_1 = arith.constant 0 : i32
    return %c0_i32, %c0_i32_0 : i32, i32
  }
  func.func @transform_9(%arg0: i32, %arg1: memref<8xi32, #tpu.memory_space<smem>>) -> (i32, i32) {
    %c0_i32 = arith.constant 0 : i32
    %c0_i32_0 = arith.constant 0 : i32
    %c0_i32_1 = arith.constant 0 : i32
    return %c0_i32, %c0_i32_0 : i32, i32
  }
}

</mosaic_0001>

<bundles_post_ra>
// kernel: tpu_custom_call.1
= control target key start
LH: loop header
LB: loop body
LE: loop exit
PB: predicated region body
PF: predicated region fallthrough
CT: control target
= control target key end

     0   :  { %s2952_s0 = inlined_call_operand.hbm [shape: s32[8], index: 0, kind: input, shape index: {}]   ;;  %s2953_s1 = inlined_call_operand.hbm [shape: f32[64,128], index: 1, kind: input, shape index: {}]   ;;  %s2954_s2 = inlined_call_operand.vmem [shape: f32[1,128], index: 2, kind: input, shape index: {}]   ;;  %s2955_s3 = inlined_call_operand.hbm [shape: bf16[128,384], index: 3, kind: input, shape index: {}]   ;;  %s2956_s4 = inlined_call_operand.hbm [shape: bf16[128,384], index: 4, kind: input, shape index: {}]   ;;  %s2957_s5 = inlined_call_operand.vmem [shape: f32[1,384], index: 5, kind: input, shape index: {}]   ;;  %s2958_s6 = inlined_call_operand.vmem [shape: f32[1,384], index: 6, kind: input, shape index: {}]   ;;  %s2959_s7 = inlined_call_operand.hbm [shape: bf16[128,128], index: 7, kind: input, shape index: {}]   ;;  %s2960_s8 = inlined_call_operand.vmem [shape: f32[1,128], index: 8, kind: input, shape index: {}]   ;;  %s2961_s9 = inlined_call_operand.hbm [shape: f32[8,128], index: 9, kind: output, shape index: {0}]   ;;  %s2962_s10 = inlined_call_operand.hbm [shape: f32[1,128], index: 10, kind: output, shape index: {1}]  }
   0x1   :  { %s2192_s15 = scalar_lea.hbm %s2952_s0, 16 }
   0x2   :  { %p2193_p0 = scmp.ne.s32.totalorder %s2952_s0, %s2192_s15  ;;  %p2196_p1 = scmp.lt.u32.totalorder %s2192_s15, %s2952_s0 }
   0x4   :  { %p2198_p2 = pnand %p2196_p1, %p2193_p0 }
   0x6   :  { %2201 = shalt.err (!%p2198_p2)  }
   0x7   :  { %s2346_s20 = smov [#allocation6]  }
   0x8   :  { %17 = dma.hbm_to_smem %s2952_s0, 16, %s2346_s20, [#allocation5] }
   0x9   :  { %2334 = dma.done.wait [#allocation5], 16 }
   0xa   :  { %2335 = vsyncadd [#allocation5], 4294967280 }
   0xb   :  { %19 = sfence }
   0xc   :  { %20 = vsyncpa [#allocation8], 0 }
   0xd   :  { %21 = vsyncpa [#allocation11], 0 }
   0xe   :  { %22 = vsyncpa [#allocation14], 0 }
   0xf   :  { %23 = vsyncpa [#allocation9], 0 }
  0x10   :  { %24 = vsyncpa [#allocation17], 0  ;;  %s2347_s23 = smov [#allocation10]   ;;  %s2202_s27 = scalar_lea.hbm %s2955_s3, 3072 }
  0x11   :  { %s44_s24 = sshll.u32 %s2347_s23, 4  ;;  %p2203_p3 = scmp.ne.s32.totalorder %s2955_s3, %s2202_s27  ;;  %s45_s24 = int_to_ptr.vmem [resolvable:$true] %s44_s24 }
  0x12   :  { %p2206_p4 = scmp.lt.u32.totalorder %s2202_s27, %s2955_s3 }
  0x14   :  { %p2208_p5 = pnand %p2206_p4, %p2203_p3 }
  0x16   :  { %2211 = shalt.err (!%p2208_p5)
}
  0x17   :  { %s2212_s11 = scalar_lea.vmem %s45_s24, 3072  ;;  %p2217_p7 = scmp.lt.s32.totalorder %s45_s24, %s45_s24 }
  0x18   :  { %p2213_p6 = scmp.ne.s32.totalorder %s45_s24, %s2212_s11  ;;  %p2218_p8 = scmp.lt.s32.totalorder %s2212_s11, %s2212_s11 }
  0x1a   :  { %p2219_p9 = por %p2218_p8, %p2217_p7 }
  0x1c   :  { %p2220_p10 = pnand %p2219_p9, %p2213_p6 }
  0x1e   :  { %2223 = shalt.err (!%p2220_p10)
}
  0x1f   :  { %s2348_s12 = smov 192   ;;  %s2349_s13 = smov 12  }
  0x20   :  { %50 = dma.hbm_to_vmem [thread:$0]  %s2955_s3, 3072, %s45_s24, [#allocation11], %s2348_s12, %s2348_s12, %s2349_s13  }
  0x21   :  { %s2350_s16 = smov [#allocation7]   ;;  %s2224_s20 = scalar_lea.hbm %s2953_s1, 1024 }
  0x22   :  { %s30_s17 = sshll.u32 %s2350_s16, 4  ;;  %p2225_p11 = scmp.ne.s32.totalorder %s2953_s1, %s2224_s20  ;;  %s31_s17 = int_to_ptr.vmem [resolvable:$true] %s30_s17 }
  0x23   :  { %p2228_p12 = scmp.lt.u32.totalorder %s2224_s20, %s2953_s1 }
  0x25   :  { %p2230_p13 = pnand %p2228_p12, %p2225_p11 }
  0x27   :  { %2233 = shalt.err (!%p2230_p13)
}
  0x28   :  { %s2234_s26 = scalar_lea.vmem %s31_s17, 1024  ;;  %p2239_p1 = scmp.lt.s32.totalorder %s31_s17, %s31_s17 }
  0x29   :  { %p2235_p0 = scmp.ne.s32.totalorder %s31_s17, %s2234_s26  ;;  %p2240_p2 = scmp.lt.s32.totalorder %s2234_s26, %s2234_s26 }
  0x2b   :  { %p2241_p3 = por %p2240_p2, %p2239_p1 }
  0x2d   :  { %p2242_p4 = pnand %p2241_p3, %p2235_p0 }
  0x2f   :  { %2245 = shalt.err (!%p2242_p4)
}
  0x30   :  { %s2351_s3 = smov 128   ;;  %s2352_s24 = smov 8  }
  0x31   :  { %36 = dma.hbm_to_vmem [thread:$0]  %s2953_s1, 1024, %s31_s17, [#allocation8], %s2351_s3, %s2351_s3, %s2352_s24  }
  0x32   :  { %s2353_s29 = smov [#allocation12]   ;;  %s2354_s30 = smov [#allocation13]  }
  0x33   :  { %s56_s0 = sshll.u32 %s2353_s29, 4  ;;  %s72_s11 = sshll.u32 %s2354_s30, 4  ;;  %s57_s0 = int_to_ptr.vmem [resolvable:$true] %s56_s0  ;;  %s2456_s11 = int_to_ptr.vmem [resolvable:$true] %s72_s11 }
  0x34   :  { %s2246_s16 = scalar_lea.hbm %s2956_s4, 3072 }
  0x35   :  { %p2247_p5 = scmp.ne.s32.totalorder %s2956_s4, %s2246_s16  ;;  %p2250_p6 = scmp.lt.u32.totalorder %s2246_s16, %s2956_s4 }
  0x37   :  { %p2252_p7 = pnand %p2250_p6, %p2247_p5 }
  0x39   :  { %2255 = shalt.err (!%p2252_p7)
}
  0x3a   :  { %s2256_s1 = scalar_lea.vmem %s57_s0, 3072  ;;  %p2261_p9 = scmp.lt.s32.totalorder %s57_s0, %s57_s0 }
  0x3b   :  { %p2257_p8 = scmp.ne.s32.totalorder %s57_s0, %s2256_s1  ;;  %p2262_p10 = scmp.lt.s32.totalorder %s2256_s1, %s2256_s1 }
  0x3d   :  { %p2263_p11 = por %p2262_p10, %p2261_p9 }
  0x3f   :  { %p2264_p12 = pnand %p2263_p11, %p2257_p8 }
  0x41   :  { %2267 = shalt.err (!%p2264_p12)
}
  0x42   :  { %62 = dma.hbm_to_vmem [thread:$0]  %s2956_s4, 3072, %s57_s0, [#allocation11], %s2348_s12, %s2348_s12, %s2349_s13  }
  0x43   :  { %s2268_s26 = scalar_lea.hbm %s2959_s7, 1024 }
  0x44   :  { %p2269_p13 = scmp.ne.s32.totalorder %s2959_s7, %s2268_s26  ;;  %p2272_p0 = scmp.lt.u32.totalorder %s2268_s26, %s2959_s7 }
  0x46   :  { %p2274_p1 = pnand %p2272_p0, %p2269_p13 }
  0x48   :  { %2277 = shalt.err (!%p2274_p1)
}
  0x49   :  { %s2278_s29 = scalar_lea.vmem %s2456_s11, 1024  ;;  %p2283_p3 = scmp.lt.s32.totalorder %s2456_s11, %s2456_s11 }
  0x4a   :  { %p2279_p2 = scmp.ne.s32.totalorder %s2456_s11, %s2278_s29  ;;  %p2284_p4 = scmp.lt.s32.totalorder %s2278_s29, %s2278_s29 }
  0x4c   :  { %p2285_p5 = por %p2284_p4, %p2283_p3 }
  0x4e   :  { %p2286_p6 = pnand %p2285_p5, %p2279_p2 }
  0x50   :  { %2289 = shalt.err (!%p2286_p6)
}
  0x51   :  { %s2355_s4 = smov 64   ;;  %s2356_s12 = smov 4  }
  0x52   :  { %78 = dma.hbm_to_vmem [thread:$0]  %s2959_s7, 1024, %s2456_s11, [#allocation14], %s2355_s4, %s2355_s4, %s2356_s12  }
  0x53   :  { %2336 = dma.done.wait [#allocation8], 1024  }
  0x54   :  { %2337 = vsyncadd [#allocation8], 4294966272 }
  0x55   :  { %2338 = dma.done.wait [#allocation11], 6144  }
  0x56   :  { %2339 = vsyncadd [#allocation11], 4294961152 }
  0x57   :  { %2340 = dma.done.wait [#allocation14], 1024  }
  0x58   :  { %2341 = vsyncadd [#allocation14], 4294966272  ;;  %v2357_v0 = vmov 0.0   ;;  %v2358_v1 = vmov 0   ;;  %vm2359_vm0 = vmmov 0   ;;  %s2494_s30 = sld [smem:[#allocation6]] }
  0x59   :  { %1796 = vmatprep.subr.bf16.mxu1 %v2357_v0  ;;  %345 = vmatprep.mubr.bf16.mxu0 %v2358_v1  ;;  %s2496_s14 = sld [smem:[#allocation6 + $0x1]]  ;;  %v2012_v2 = vld [vmem:[#allocation10 + $0x4] ss:$12 sps:$4 sm:$0xff]   ;;  %s2498_s7 = sld [smem:[#allocation6 + $0x2]]  ;;  %v2014_v3 = vld [vmem:[#allocation10] ss:$12 sps:$4 sm:$0xff]  }
  0x5a   :  { %1812 = vmatprep.mubr.msk.bf16.mxu1 %vm2359_vm0, %v2357_v0  ;;  %313 = vmatprep.subr.bf16.mxu0 %v2012_v2  ;;  %v2015_v4 = vld [vmem:[#allocation10 + $0x8] ss:$12 sps:$4 sm:$0xff]   ;;  %s2500_s11 = sld [smem:[#allocation6 + $0x3]]  ;;  %v2018_v6 = vld [vmem:[#allocation10 + $0x18] ss:$12 sps:$4 sm:$0xff]   ;;  %s2503_s15 = sld [smem:[#allocation6 + $0x4]] }
  0x5b   :  { %314 = vmatpush1.bf16.msra.mxu0 %v2014_v3  ;;  %v2016_v5 = vld [vmem:[#allocation10 + $0x1c] ss:$12 sps:$4 sm:$0xff]   ;;  %1797 = vmatpush3.bf16.msra.mxu1 %v2015_v4  ;;  %v2019_v7 = vld [vmem:[#allocation10 + $0x20] ss:$12 sps:$4 sm:$0xff]   ;;  %v2023_v10 = vld [vmem:[#allocation10 + $0x38] ss:$12 sps:$4 sm:$0xff]  }
  0x5c   :  { %315 = vmatprep.subr.bf16.mxu0 %v2016_v5  ;;  %1798 = vmatprep.subr.bf16.mxu1 %v2357_v0  ;;  %v2020_v8 = vld [vmem:[#allocation10 + $0x34] ss:$12 sps:$4 sm:$0xff]   ;;  %v2022_v9 = vld [vmem:[#allocation10 + $0x30] ss:$12 sps:$4 sm:$0xff]   ;;  %s2505_s16 = sld [smem:[#allocation6 + $0x5]]  ;;  %s2508_s18 = sld [smem:[#allocation6 + $0x6]] }
  0x5d   :  { %v2024_v11 = vld [vmem:[#allocation10 + $0x4c] ss:$12 sps:$4 sm:$0xff]   ;;  %s2510_s19 = sld [smem:[#allocation6 + $0x7]]  ;;  %v2026_v12 = vld [vmem:[#allocation10 + $0x48] ss:$12 sps:$4 sm:$0xff]   ;;  %s2360_s4 = smov [#allocation16]  }
  0x5e   :  { %v2027_v13 = vld [vmem:[#allocation10 + $0x50] ss:$12 sps:$4 sm:$0xff]   ;;  %v2030_v15 = vld [vmem:[#allocation10 + $0x60] ss:$12 sps:$4 sm:$0xff]   ;;  %v2031_v16 = vld [vmem:[#allocation10 + $0x68] ss:$12 sps:$4 sm:$0xff]  }
  0x5f   :  { %316 = vmatpush1.bf16.msra.mxu0 %v2018_v6  ;;  %1799 = vmatpush3.bf16.msra.mxu1 %v2019_v7  ;;  %v2028_v14 = vld [vmem:[#allocation10 + $0x64] ss:$12 sps:$4 sm:$0xff]   ;;  %v2032_v17 = vld [vmem:[#allocation10 + $0x7c] ss:$12 sps:$4 sm:$0xff]   ;;  %v2035_v19 = vld [vmem:[#allocation10 + $0x80] ss:$12 sps:$4 sm:$0xff]  }
  0x60   :  { %317 = vmatprep.subr.bf16.mxu0 %v2020_v8  ;;  %1800 = vmatprep.subr.bf16.mxu1 %v2357_v0  ;;  %v2034_v18 = vld [vmem:[#allocation10 + $0x78] ss:$12 sps:$4 sm:$0xff]   ;;  %v2036_v20 = vld [vmem:[#allocation10 + $0x94] ss:$12 sps:$4 sm:$0xff]   ;;  %s95_s20 = scalar_lea.vmem [#allocation7], %s2494_s30  ;;  %s100_s21 = scalar_lea.vmem [#allocation7], %s2496_s14  ;;  %v170_v8 = vlaneseq }
  0x61   :  { %v96_v21 = vld [vmem:[%s95_s20] sm:$0x1]  ;;  %s105_s1 = scalar_lea.vmem [#allocation7], %s2498_s7  ;;  %s110_s17 = scalar_lea.vmem [#allocation7], %s2500_s11  ;;  %v2038_v36 = vld [vmem:[#allocation10 + $0x90] ss:$12 sps:$4 sm:$0xff]  }
  0x62   :  { %v97_v22 = vmax.f32 %v96_v21, 0.0  ;;  %v101_v23 = vld [vmem:[%s100_s21] sm:$0x1]  ;;  %s115_s22 = scalar_lea.vmem [#allocation7], %s2503_s15  ;;  %s120_s23 = scalar_lea.vmem [#allocation7], %s2505_s16 }
  0x63   :  { %318 = vmatpush1.bf16.msra.mxu0 %v2022_v9  ;;  %1801 = vmatpush3.bf16.msra.mxu1 %v2023_v10  ;;  %v106_v24 = vld [vmem:[%s105_s1] sm:$0x1]  ;;  %v102_v25 = vmax.f32 %v101_v23, 0.0  ;;  %s125_s25 = scalar_lea.vmem [#allocation7], %s2508_s18  ;;  %s130_s26 = scalar_lea.vmem [#allocation7], %s2510_s19  ;;  %v171_v9 = vshrl.u32 %v170_v8, 7 }
  0x64   :  { %319 = vmatprep.subr.bf16.mxu0 %v2024_v11  ;;  %1802 = vmatprep.subr.bf16.mxu1 %v2357_v0  ;;  %v107_v26 = vmax.f32 %v106_v24, 0.0  ;;  %v111_v27 = vld [vmem:[%s110_s17] sm:$0x1]  ;;  %98 = vst [vmem:[#allocation2] sm:$0x1] %v97_v22  ;;  %s1603_s12 = sshll.u32 %s2360_s4, 4  ;;  %s1604_s12 = int_to_ptr.vmem [resolvable:$true] %s1603_s12 }
  0x65   :  { %v116_v28 = vld [vmem:[%s115_s22] sm:$0x1]  ;;  %v112_v29 = vmax.f32 %v111_v27, 0.0  ;;  %103 = vst [vmem:[#allocation2 + $0x1] sm:$0x1] %v102_v25  ;;  %v172_v10 = vsub.s32 0, %v171_v9  ;;  %p2295_p8 = scmp.lt.s32.totalorder %s1604_s12, %s1604_s12 }
  0x66   :  { %v117_v30 = vmax.f32 %v116_v28, 0.0  ;;  %v121_v31 = vld [vmem:[%s120_s23] sm:$0x1]  ;;  %108 = vst [vmem:[#allocation2 + $0x2] sm:$0x1] %v107_v26  ;;  %v180_v11 = vsub.s32 2, %v171_v9 }
  0x67   :  { %320 = vmatpush1.bf16.msra.mxu0 %v2026_v12  ;;  %1803 = vmatpush3.bf16.msra.mxu1 %v2027_v13  ;;  %v126_v32 = vld [vmem:[%s125_s25] sm:$0x1]  ;;  %v122_v33 = vmax.f32 %v121_v31, 0.0  ;;  %113 = vst [vmem:[#allocation2 + $0x3] sm:$0x1] %v112_v29  ;;  %v176_v13 = vsub.s32 1, %v171_v9 }
  0x68   :  { %321 = vmatprep.subr.bf16.mxu0 %v2028_v14  ;;  %1804 = vmatprep.subr.bf16.mxu1 %v2357_v0  ;;  %v127_v34 = vmax.f32 %v126_v32, 0.0  ;;  %v131_v35 = vld [vmem:[%s130_s26] sm:$0x1]  ;;  %118 = vst [vmem:[#allocation2 + $0x4] sm:$0x1] %v117_v30  ;;  %s2290_s13 = scalar_lea.vmem %s1604_s12, 16 }
  0x69   :  { %v132_v37 = vmax.f32 %v131_v35, 0.0  ;;  %v2039_v38 = vld [vmem:[#allocation10 + $0x98] ss:$12 sps:$4 sm:$0xff]   ;;  %123 = vst [vmem:[#allocation2 + $0x5] sm:$0x1] %v122_v33  ;;  %p2291_p7 = scmp.ne.s32.totalorder %s1604_s12, %s2290_s13  ;;  %s2294_s0 = scalar_lea.vmem %s1604_s12, 32 }
  0x6a   :  { %v2040_v39 = vld [vmem:[#allocation10 + $0xac] ss:$12 sps:$4 sm:$0xff]   ;;  %128 = vst [vmem:[#allocation2 + $0x6] sm:$0x1] %v127_v34  ;;  %v2042_v40 = vld [vmem:[#allocation10 + $0xa8] ss:$12 sps:$4 sm:$0xff]   ;;  %p2296_p9 = scmp.lt.s32.totalorder %s2294_s0, %s2290_s13 }
  0x6b   :  { %322 = vmatpush1.bf16.msra.mxu0 %v2030_v15  ;;  %1805 = vmatpush3.bf16.msra.mxu1 %v2031_v16  ;;  %133 = vst [vmem:[#allocation2 + $0x7] sm:$0x1] %v132_v37  ;;  %v2043_v41 = vld [vmem:[#allocation10 + $0xb0] ss:$12 sps:$4 sm:$0xff]   ;;  %v2527_v43 = vld [vmem:[#allocation12] ss:$12 sps:$4 sm:$0xff]  }
  0x6c   :  { %323 = vmatprep.subr.bf16.mxu0 %v2032_v17  ;;  %1806 = vmatprep.subr.bf16.mxu1 %v2357_v0  ;;  %v2524_v42 = vld [vmem:[#allocation12 + $0x4] ss:$12 sps:$4 sm:$0xff]   ;;  %v2530_v45 = vld [vmem:[#allocation12 + $0x8] ss:$12 sps:$4 sm:$0xff]   ;;  %v2539_v49 = vld [vmem:[#allocation12 + $0x20] ss:$12 sps:$4 sm:$0xff]   ;;  %p2297_p10 = por %p2296_p9, %p2295_p8 }
  0x6d   :  { %v2532_v47 = vld [vmem:[#allocation12 + $0x1c] ss:$12 sps:$4 sm:$0xff]   ;;  %v2535_v48 = vld [vmem:[#allocation12 + $0x18] ss:$12 sps:$4 sm:$0xff]   ;;  %v2542_v50 = vld [vmem:[#allocation12 + $0x34] ss:$12 sps:$4 sm:$0xff]  }
  0x6e   :  { %v2548_v51 = vld [vmem:[#allocation12 + $0x30] ss:$12 sps:$4 sm:$0xff]   ;;  %v2552_v52 = vld [vmem:[#allocation12 + $0x38] ss:$12 sps:$4 sm:$0xff]   ;;  %v2558_v54 = vld [vmem:[#allocation12 + $0x48] ss:$12 sps:$4 sm:$0xff]   ;;  %p2298_p11 = pnand %p2297_p10, %p2291_p7 }
  0x6f   :  { %324 = vmatpush1.bf16.msra.mxu0 %v2034_v18  ;;  %1807 = vmatpush3.bf16.msra.mxu1 %v2035_v19  ;;  %v2555_v53 = vld [vmem:[#allocation12 + $0x4c] ss:$12 sps:$4 sm:$0xff]   ;;  %v2560_v55 = vld [vmem:[#allocation12 + $0x50] ss:$12 sps:$4 sm:$0xff]   ;;  %v2572_v58 = vld [vmem:[#allocation12 + $0x68] ss:$12 sps:$4 sm:$0xff]  }
  0x70   :  { %325 = vmatprep.subr.bf16.mxu0 %v2036_v20  ;;  %1808 = vmatprep.subr.bf16.mxu1 %v2357_v0  ;;  %v2562_v56 = vld [vmem:[#allocation12 + $0x64] ss:$12 sps:$4 sm:$0xff]   ;;  %v2569_v57 = vld [vmem:[#allocation12 + $0x60] ss:$12 sps:$4 sm:$0xff]   ;;  %v2575_v59 = vld [vmem:[#allocation12 + $0x7c] ss:$12 sps:$4 sm:$0xff]  }
  0x71   :  { %v2579_v60 = vld [vmem:[#allocation12 + $0x78] ss:$12 sps:$4 sm:$0xff]   ;;  %v2582_v61 = vld [vmem:[#allocation12 + $0x80] ss:$12 sps:$4 sm:$0xff]   ;;  %v2589_v63 = vld [vmem:[#allocation12 + $0x90] ss:$12 sps:$4 sm:$0xff]  }
  0x72   :  { %v134_v44 = vld [vmem:[#allocation2] sm:$0xff]  ;;  %v2585_v62 = vld [vmem:[#allocation12 + $0x94] ss:$12 sps:$4 sm:$0xff]   ;;  %v2604_v5 = vld [vmem:[%s2954_s2] sm:$0x1] }
  0x73   :  { %326 = vmatpush1.bf16.msra.mxu0 %v2038_v36  ;;  %1809 = vmatpush3.bf16.msra.mxu1 %v2039_v38  ;;  %v135_v46 = vpack.c.bf16 %v134_v44, %v134_v44  ;;  %v2592_v2 = vld [vmem:[#allocation12 + $0x98] ss:$12 sps:$4 sm:$0xff]   ;;  %v2599_v4 = vld [vmem:[#allocation12 + $0xa8] ss:$12 sps:$4 sm:$0xff]   ;;  %v2607_v6 = vld [vmem:[#allocation12 + $0xb0] ss:$12 sps:$4 sm:$0xff]   ;;  %v432_v7 = vpack.c.bf16 %v2604_v5, %v2604_v5 }
  0x74   :  { %327 = vmatprep.subr.bf16.mxu0 %v2040_v39  ;;  %1810 = vmatprep.subr.bf16.mxu1 %v2357_v0  ;;  %v2595_v3 = vld [vmem:[#allocation12 + $0xac] ss:$12 sps:$4 sm:$0xff]   ;;  %v168_v12 = vld [vmem:[%s2957_s5] sm:$0x7] }
  0x75   :  { %v173_v14 = vrot.slane %v168_v12, %v172_v10  ;;  %v181_v15 = vrot.slane %v168_v12, %v180_v11  ;;  %v177_v16 = vrot.slane %v168_v12, %v176_v13  ;;  %v429_v28 = vld [vmem:[%s2958_s6] sm:$0x7] }
  0x76   :  { %v2658_v29 = vrot.slane %v429_v28, %v172_v10  ;;  %v2660_v30 = vrot.slane %v429_v28, %v176_v13  ;;  %v2664_v13 = vrot.slane %v429_v28, %v180_v11 }
  0x77   :  { %328 = vmatpush1.bf16.msra.mxu0 %v2042_v40  ;;  %1811 = vmatpush3.bf16.msra.mxu1 %v2043_v41 }
  0x78   :  { %577 = vmatprep.subr.bf16.mxu0 %v2524_v42  ;;  %1816 = vmatprep.subr.bf16.mxu1 %v2357_v0 }
  0x7a   :  { %346 = vmatmul.mubr.bf16.vlgmr.msra.gmra.mrb[0].mxu0 %v135_v46  ;;  %1813 = vmatmul.mubr.bf16.vlgmr.msra.gmra.mrb[0].mxu1 %v135_v46 }
  0x7b   :  { %578 = vmatpush1.bf16.msra.mxu0 %v2527_v43  ;;  %1817 = vmatpush3.bf16.msra.mxu1 %v2530_v45 }
  0x7c   :  { %579 = vmatprep.subr.bf16.mxu0 %v2532_v47  ;;  %1818 = vmatprep.subr.bf16.mxu1 %v2357_v0 }
  0x7d   :  { %609 = vmatprep.mubr.bf16.mxu0 %v2358_v1  ;;  %1832 = vmatprep.mubr.msk.bf16.mxu1 %vm2359_vm0, %v2357_v0 }
  0x7f   :  { %580 = vmatpush1.bf16.msra.mxu0 %v2535_v48  ;;  %1819 = vmatpush3.bf16.msra.mxu1 %v2539_v49 }
  0x80   :  { %581 = vmatprep.subr.bf16.mxu0 %v2542_v50  ;;  %1820 = vmatprep.subr.bf16.mxu1 %v2357_v0 }
  0x83   :  { %582 = vmatpush1.bf16.msra.mxu0 %v2548_v51  ;;  %1821 = vmatpush3.bf16.msra.mxu1 %v2552_v52 }
  0x84   :  { %583 = vmatprep.subr.bf16.mxu0 %v2555_v53  ;;  %1822 = vmatprep.subr.bf16.mxu1 %v2357_v0 }
  0x87   :  { %584 = vmatpush1.bf16.msra.mxu0 %v2558_v54  ;;  %1823 = vmatpush3.bf16.msra.mxu1 %v2560_v55 }
  0x88   :  { %585 = vmatprep.subr.bf16.mxu0 %v2562_v56  ;;  %1824 = vmatprep.subr.bf16.mxu1 %v2357_v0 }
  0x8b   :  { %586 = vmatpush1.bf16.msra.mxu0 %v2569_v57  ;;  %1825 = vmatpush3.bf16.msra.mxu1 %v2572_v58 }
  0x8c   :  { %587 = vmatprep.subr.bf16.mxu0 %v2575_v59  ;;  %1826 = vmatprep.subr.bf16.mxu1 %v2357_v0 }
  0x8f   :  { %588 = vmatpush1.bf16.msra.mxu0 %v2579_v60  ;;  %1827 = vmatpush3.bf16.msra.mxu1 %v2582_v61 }
  0x90   :  { %589 = vmatprep.subr.bf16.mxu0 %v2585_v62  ;;  %1828 = vmatprep.subr.bf16.mxu1 %v2357_v0 }
  0x93   :  { %590 = vmatpush1.bf16.msra.mxu0 %v2589_v63  ;;  %1829 = vmatpush3.bf16.msra.mxu1 %v2592_v2 }
  0x94   :  { %591 = vmatprep.subr.bf16.mxu0 %v2595_v3  ;;  %1830 = vmatprep.subr.bf16.mxu1 %v2357_v0 }
  0x97   :  { %592 = vmatpush1.bf16.msra.mxu0 %v2599_v4  ;;  %1831 = vmatpush3.bf16.msra.mxu1 %v2607_v6 }
  0x98   :  { %688 = vmatprep.subr.bf16.mxu0 %v2524_v42  ;;  %1836 = vmatprep.subr.bf16.mxu1 %v2357_v0 }
  0x9a   :  { %610 = vmatmul.mubr.bf16.vlgmr.msra.gmra.mrb[4].mxu0 %v432_v7  ;;  %1833 = vmatmul.mubr.bf16.vlgmr.msra.gmra.mrb[4].mxu1 %v432_v7 }
  0x9b   :  { %689 = vmatpush1.bf16.msra.mxu0 %v2527_v43  ;;  %1837 = vmatpush3.bf16.msra.mxu1 %v2530_v45 }
  0x9c   :  { %690 = vmatprep.subr.bf16.mxu0 %v2532_v47  ;;  %1838 = vmatprep.subr.bf16.mxu1 %v2357_v0 }
  0x9d   :  { %720 = vmatprep.mubr.bf16.mxu0 %v2358_v1  ;;  %1852 = vmatprep.mubr.msk.bf16.mxu1 %vm2359_vm0, %v2357_v0 }
  0x9f   :  { %691 = vmatpush1.bf16.msra.mxu0 %v2535_v48  ;;  %1839 = vmatpush3.bf16.msra.mxu1 %v2539_v49 }
  0xa0   :  { %692 = vmatprep.subr.bf16.mxu0 %v2542_v50  ;;  %1840 = vmatprep.subr.bf16.mxu1 %v2357_v0 }
  0xa3   :  { %693 = vmatpush1.bf16.msra.mxu0 %v2548_v51  ;;  %1841 = vmatpush3.bf16.msra.mxu1 %v2552_v52 }
  0xa4   :  { %694 = vmatprep.subr.bf16.mxu0 %v2555_v53  ;;  %1842 = vmatprep.subr.bf16.mxu1 %v2357_v0 }
  0xa7   :  { %695 = vmatpush1.bf16.msra.mxu0 %v2558_v54  ;;  %1843 = vmatpush3.bf16.msra.mxu1 %v2560_v55 }
  0xa8   :  { %696 = vmatprep.subr.bf16.mxu0 %v2562_v56  ;;  %1844 = vmatprep.subr.bf16.mxu1 %v2357_v0 }
  0xab   :  { %697 = vmatpush1.bf16.msra.mxu0 %v2569_v57  ;;  %1845 = vmatpush3.bf16.msra.mxu1 %v2572_v58 }
  0xac   :  { %698 = vmatprep.subr.bf16.mxu0 %v2575_v59  ;;  %1846 = vmatprep.subr.bf16.mxu1 %v2357_v0 }
  0xaf   :  { %699 = vmatpush1.bf16.msra.mxu0 %v2579_v60  ;;  %1847 = vmatpush3.bf16.msra.mxu1 %v2582_v61 }
  0xb0   :  { %700 = vmatprep.subr.bf16.mxu0 %v2585_v62  ;;  %1848 = vmatprep.subr.bf16.mxu1 %v2357_v0 }
  0xb3   :  { %701 = vmatpush1.bf16.msra.mxu0 %v2589_v63  ;;  %1849 = vmatpush3.bf16.msra.mxu1 %v2592_v2 }
  0xb4   :  { %702 = vmatprep.subr.bf16.mxu0 %v2595_v3  ;;  %1850 = vmatprep.subr.bf16.mxu1 %v2357_v0 }
  0xb7   :  { %703 = vmatpush1.bf16.msra.mxu0 %v2599_v4  ;;  %1851 = vmatpush3.bf16.msra.mxu1 %v2607_v6 }
  0xb8   :  { %799 = vmatprep.subr.bf16.mxu0 %v2524_v42  ;;  %1856 = vmatprep.subr.bf16.mxu1 %v2357_v0 }
 0x14d   :  { %v347_v17 = vpop.f32.mrb[0].mxu0  ;;  %v388_v18 = vpop.f32.mrb[0].mxu1 }
 0x14e   :  { %v348_v19 = vadd.f32 %v347_v17, %v173_v14  ;;  %v349_v20 = vpop.f32.mrb[1].mxu0  ;;  %v389_v21 = vadd.f32 %v388_v18, %v181_v15  ;;  %v1814_v22 = vpop.f32.mrb[1].mxu1 }
 0x14f   :  { %v350_v23 = vadd.f32 %v349_v20, %v177_v16  ;;  %v351_v24 = vpop.f32.mrb[2].mxu0  ;;  %v391_v25 = vpop.f32.mrb[2].mxu1 }
 0x150   :  { %394 = vst [vmem:[#allocation3] sm:$0xff] %v348_v19  ;;  %396 = vst [vmem:[#allocation3 + $0x10] sm:$0xff] %v389_v21  ;;  %v352_v26 = vpop.f32.mrb[3].mxu0  ;;  %v1815_v27 = vpop.f32.mrb[3].mxu1 }
 0x151   :  { %395 = vst [vmem:[#allocation3 + $0x8] sm:$0xff] %v350_v23 }
 0x158   :  { %v431_v33 = vld [vmem:[#allocation3] ss:$8 sm:$0x7]  ;;  %v686_v28 = vld [vmem:[#allocation3 + $0x1] ss:$8 sm:$0x7] }
 0x159   :  { %v666_v46 = vrot.slane %v431_v33, 1  ;;  %v676_v19 = vrot.slane %v431_v33, 2 }
 0x16d   :  { %v611_v31 = vpop.f32.mrb[4].mxu0  ;;  %v652_v32 = vpop.f32.mrb[4].mxu1 }
 0x16e   :  { %v612_v34 = vadd.f32 %v611_v31, %v2658_v29  ;;  %v613_v35 = vpop.f32.mrb[5].mxu0  ;;  %v1834_v36 = vpop.f32.mrb[5].mxu1  ;;  %v653_v16 = vadd.f32 %v652_v32, %v2664_v13 }
 0x16f   :  { %v614_v37 = vadd.f32 %v613_v35, %v2660_v30  ;;  %v615_v38 = vpop.f32.mrb[6].mxu0  ;;  %v655_v39 = vpop.f32.mrb[6].mxu1 }
 0x170   :  { %v658_v40 = vadd.f32 %v612_v34, %v431_v33  ;;  %v616_v41 = vpop.f32.mrb[7].mxu0  ;;  %v1835_v44 = vpop.f32.mrb[7].mxu1 }
 0x171   :  { %v668_v8 = vadd.f32 %v666_v46, %v614_v37 }
 0x172   :  { %v1681_v7 = vmul.f32 -1.442695, %v658_v40  ;;  %v777_v40 = vrot.slane %v686_v28, 1 }
 0x173   :  { %v1682_v9 = vmul.f32 -1.442695, %v668_v8 }
 0x174   :  { %2084 = vpow2.f32 %v1681_v7 }
 0x175   :  { %2086 = vpow2.f32 %v1682_v9 }
 0x17e   :  { %v2085_v10 = vpop.eup %2084 }
 0x17f   :  { %v662_v12 = vadd.f32 1.0, %v2085_v10  ;;  %v2087_v14 = vpop.eup %2086 }
 0x180   :  { %v672_v15 = vadd.f32 1.0, %v2087_v14 }
 0x181   :  { %2088 = vrcp.f32 %v662_v12 }
 0x182   :  { %2090 = vrcp.f32 %v672_v15 }
 0x18b   :  { %v2089_v17 = vpop.eup %2088 }
 0x18c   :  { %v675_v18 = vmul.f32 %v2089_v17, %v653_v16  ;;  %v2091_v21 = vpop.eup %2090  ;;  %v787_v16 = vrot.slane %v686_v28, 2 }
 0x18d   :  { %v680_v22 = vsub.f32 1.0, %v2091_v21  ;;  %v682_v25 = vmul.f32 %v2091_v21, %v2604_v5 }
 0x18e   :  { %v678_v20 = vadd.f32 %v676_v19, %v675_v18 }
 0x190   :  { %2092 = vtanh.f32 %v678_v20 }
 0x19a   :  { %v2093_v23 = vpop.eup %2092 }
 0x19b   :  { %v681_v24 = vmul.f32 %v2093_v23, %v680_v22 }
 0x19d   :  { %v2668_v26 = vadd.f32 %v682_v25, %v681_v24 }
 0x19f   :  { %684 = vst [vmem:[#allocation4] sm:$0x1] %v2668_v26  ;;  %v687_v11 = vpack.c.bf16 %v2668_v26, %v2668_v26 }
 0x1a1   :  { %721 = vmatmul.mubr.bf16.vlgmr.msra.gmra.mrb[8].mxu0 %v687_v11  ;;  %1853 = vmatmul.mubr.bf16.vlgmr.msra.gmra.mrb[8].mxu1 %v687_v11  ;;  %v797_v11 = vld [vmem:[#allocation3 + $0x2] ss:$8 sm:$0x7] }
 0x1a2   :  { %800 = vmatpush1.bf16.msra.mxu0 %v2527_v43  ;;  %1857 = vmatpush3.bf16.msra.mxu1 %v2530_v45 }
 0x1a3   :  { %801 = vmatprep.subr.bf16.mxu0 %v2532_v47  ;;  %1858 = vmatprep.subr.bf16.mxu1 %v2357_v0 }
 0x1a4   :  { %831 = vmatprep.mubr.bf16.mxu0 %v2358_v1  ;;  %1872 = vmatprep.mubr.msk.bf16.mxu1 %vm2359_vm0, %v2357_v0 }
 0x1a6   :  { %802 = vmatpush1.bf16.msra.mxu0 %v2535_v48  ;;  %1859 = vmatpush3.bf16.msra.mxu1 %v2539_v49 }
 0x1a7   :  { %803 = vmatprep.subr.bf16.mxu0 %v2542_v50  ;;  %1860 = vmatprep.subr.bf16.mxu1 %v2357_v0 }
 0x1aa   :  { %804 = vmatpush1.bf16.msra.mxu0 %v2548_v51  ;;  %1861 = vmatpush3.bf16.msra.mxu1 %v2552_v52 }
 0x1ab   :  { %805 = vmatprep.subr.bf16.mxu0 %v2555_v53  ;;  %1862 = vmatprep.subr.bf16.mxu1 %v2357_v0 }
 0x1ae   :  { %806 = vmatpush1.bf16.msra.mxu0 %v2558_v54  ;;  %1863 = vmatpush3.bf16.msra.mxu1 %v2560_v55 }
 0x1af   :  { %807 = vmatprep.subr.bf16.mxu0 %v2562_v56  ;;  %1864 = vmatprep.subr.bf16.mxu1 %v2357_v0 }
 0x1b2   :  { %808 = vmatpush1.bf16.msra.mxu0 %v2569_v57  ;;  %1865 = vmatpush3.bf16.msra.mxu1 %v2572_v58 }
 0x1b3   :  { %809 = vmatprep.subr.bf16.mxu0 %v2575_v59  ;;  %1866 = vmatprep.subr.bf16.mxu1 %v2357_v0 }
 0x1b6   :  { %810 = vmatpush1.bf16.msra.mxu0 %v2579_v60  ;;  %1867 = vmatpush3.bf16.msra.mxu1 %v2582_v61 }
 0x1b7   :  { %811 = vmatprep.subr.bf16.mxu0 %v2585_v62  ;;  %1868 = vmatprep.subr.bf16.mxu1 %v2357_v0 }
 0x1ba   :  { %812 = vmatpush1.bf16.msra.mxu0 %v2589_v63  ;;  %1869 = vmatpush3.bf16.msra.mxu1 %v2592_v2 }
 0x1bb   :  { %813 = vmatprep.subr.bf16.mxu0 %v2595_v3  ;;  %1870 = vmatprep.subr.bf16.mxu1 %v2357_v0 }
 0x1be   :  { %814 = vmatpush1.bf16.msra.mxu0 %v2599_v4  ;;  %1871 = vmatpush3.bf16.msra.mxu1 %v2607_v6 }
 0x1bf   :  { %910 = vmatprep.subr.bf16.mxu0 %v2524_v42  ;;  %1876 = vmatprep.subr.bf16.mxu1 %v2357_v0 }
 0x274   :  { %v722_v5 = vpop.f32.mrb[8].mxu0  ;;  %v763_v27 = vpop.f32.mrb[8].mxu1 }
 0x275   :  { %v723_v31 = vadd.f32 %v722_v5, %v2658_v29  ;;  %v724_v32 = vpop.f32.mrb[9].mxu0  ;;  %v1854_v33 = vpop.f32.mrb[9].mxu1  ;;  %v764_v12 = vadd.f32 %v763_v27, %v2664_v13 }
 0x276   :  { %v725_v34 = vadd.f32 %v724_v32, %v2660_v30  ;;  %v726_v35 = vpop.f32.mrb[10].mxu0  ;;  %v766_v36 = vpop.f32.mrb[10].mxu1 }
 0x277   :  { %v769_v37 = vadd.f32 %v723_v31, %v686_v28  ;;  %v727_v38 = vpop.f32.mrb[11].mxu0  ;;  %v1855_v39 = vpop.f32.mrb[11].mxu1 }
 0x278   :  { %v779_v44 = vadd.f32 %v777_v40, %v725_v34 }
 0x279   :  { %v1683_v41 = vmul.f32 -1.442695, %v769_v37  ;;  %v888_v37 = vrot.slane %v797_v11, 1 }
 0x27a   :  { %v1684_v46 = vmul.f32 -1.442695, %v779_v44 }
 0x27b   :  { %2094 = vpow2.f32 %v1683_v41 }
 0x27c   :  { %2096 = vpow2.f32 %v1684_v46 }
 0x285   :  { %v2095_v7 = vpop.eup %2094 }
 0x286   :  { %v773_v8 = vadd.f32 1.0, %v2095_v7  ;;  %v2097_v9 = vpop.eup %2096 }
 0x287   :  { %v783_v10 = vadd.f32 1.0, %v2097_v9 }
 0x288   :  { %2098 = vrcp.f32 %v773_v8 }
 0x289   :  { %2100 = vrcp.f32 %v783_v10 }
 0x292   :  { %v2099_v14 = vpop.eup %2098 }
 0x293   :  { %v786_v15 = vmul.f32 %v2099_v14, %v764_v12  ;;  %v2101_v18 = vpop.eup %2100  ;;  %v898_v12 = vrot.slane %v797_v11, 2 }
 0x294   :  { %v791_v19 = vsub.f32 1.0, %v2101_v18  ;;  %v793_v22 = vmul.f32 %v2101_v18, %v2668_v26 }
 0x295   :  { %v789_v17 = vadd.f32 %v787_v16, %v786_v15 }
 0x297   :  { %2102 = vtanh.f32 %v789_v17 }
 0x2a1   :  { %v2103_v20 = vpop.eup %2102 }
 0x2a2   :  { %v792_v21 = vmul.f32 %v2103_v20, %v791_v19 }
 0x2a4   :  { %v2712_v23 = vadd.f32 %v793_v22, %v792_v21 }
 0x2a6   :  { %795 = vst [vmem:[#allocation4 + $0x1] sm:$0x1] %v2712_v23  ;;  %v798_v24 = vpack.c.bf16 %v2712_v23, %v2712_v23 }
 0x2a8   :  { %832 = vmatmul.mubr.bf16.vlgmr.msra.gmra.mrb[12].mxu0 %v798_v24  ;;  %1873 = vmatmul.mubr.bf16.vlgmr.msra.gmra.mrb[12].mxu1 %v798_v24  ;;  %v908_v24 = vld [vmem:[#allocation3 + $0x3] ss:$8 sm:$0x7] }
 0x2a9   :  { %911 = vmatpush1.bf16.msra.mxu0 %v2527_v43  ;;  %1877 = vmatpush3.bf16.msra.mxu1 %v2530_v45 }
 0x2aa   :  { %912 = vmatprep.subr.bf16.mxu0 %v2532_v47  ;;  %1878 = vmatprep.subr.bf16.mxu1 %v2357_v0 }
 0x2ab   :  { %942 = vmatprep.mubr.bf16.mxu0 %v2358_v1  ;;  %1892 = vmatprep.mubr.msk.bf16.mxu1 %vm2359_vm0, %v2357_v0 }
 0x2ad   :  { %913 = vmatpush1.bf16.msra.mxu0 %v2535_v48  ;;  %1879 = vmatpush3.bf16.msra.mxu1 %v2539_v49 }
 0x2ae   :  { %914 = vmatprep.subr.bf16.mxu0 %v2542_v50  ;;  %1880 = vmatprep.subr.bf16.mxu1 %v2357_v0 }
 0x2b1   :  { %915 = vmatpush1.bf16.msra.mxu0 %v2548_v51  ;;  %1881 = vmatpush3.bf16.msra.mxu1 %v2552_v52 }
 0x2b2   :  { %916 = vmatprep.subr.bf16.mxu0 %v2555_v53  ;;  %1882 = vmatprep.subr.bf16.mxu1 %v2357_v0 }
 0x2b5   :  { %917 = vmatpush1.bf16.msra.mxu0 %v2558_v54  ;;  %1883 = vmatpush3.bf16.msra.mxu1 %v2560_v55 }
 0x2b6   :  { %918 = vmatprep.subr.bf16.mxu0 %v2562_v56  ;;  %1884 = vmatprep.subr.bf16.mxu1 %v2357_v0 }
 0x2b9   :  { %919 = vmatpush1.bf16.msra.mxu0 %v2569_v57  ;;  %1885 = vmatpush3.bf16.msra.mxu1 %v2572_v58 }
 0x2ba   :  { %920 = vmatprep.subr.bf16.mxu0 %v2575_v59  ;;  %1886 = vmatprep.subr.bf16.mxu1 %v2357_v0 }
 0x2bd   :  { %921 = vmatpush1.bf16.msra.mxu0 %v2579_v60  ;;  %1887 = vmatpush3.bf16.msra.mxu1 %v2582_v61 }
 0x2be   :  { %922 = vmatprep.subr.bf16.mxu0 %v2585_v62  ;;  %1888 = vmatprep.subr.bf16.mxu1 %v2357_v0 }
 0x2c1   :  { %923 = vmatpush1.bf16.msra.mxu0 %v2589_v63  ;;  %1889 = vmatpush3.bf16.msra.mxu1 %v2592_v2 }
 0x2c2   :  { %924 = vmatprep.subr.bf16.mxu0 %v2595_v3  ;;  %1890 = vmatprep.subr.bf16.mxu1 %v2357_v0 }
 0x2c5   :  { %925 = vmatpush1.bf16.msra.mxu0 %v2599_v4  ;;  %1891 = vmatpush3.bf16.msra.mxu1 %v2607_v6 }
 0x2c6   :  { %1021 = vmatprep.subr.bf16.mxu0 %v2524_v42  ;;  %1896 = vmatprep.subr.bf16.mxu1 %v2357_v0 }
 0x37b   :  { %v833_v25 = vpop.f32.mrb[12].mxu0  ;;  %v874_v26 = vpop.f32.mrb[12].mxu1 }
 0x37c   :  { %v834_v5 = vadd.f32 %v833_v25, %v2658_v29  ;;  %v835_v27 = vpop.f32.mrb[13].mxu0  ;;  %v1874_v28 = vpop.f32.mrb[13].mxu1  ;;  %v875_v8 = vadd.f32 %v874_v26, %v2664_v13 }
 0x37d   :  { %v836_v31 = vadd.f32 %v835_v27, %v2660_v30  ;;  %v837_v32 = vpop.f32.mrb[14].mxu0  ;;  %v877_v33 = vpop.f32.mrb[14].mxu1 }
 0x37e   :  { %v880_v34 = vadd.f32 %v834_v5, %v797_v11  ;;  %v838_v35 = vpop.f32.mrb[15].mxu0  ;;  %v1875_v36 = vpop.f32.mrb[15].mxu1 }
 0x37f   :  { %v890_v39 = vadd.f32 %v888_v37, %v836_v31 }
 0x380   :  { %v1685_v38 = vmul.f32 -1.442695, %v880_v34  ;;  %v999_v34 = vrot.slane %v908_v24, 1 }
 0x381   :  { %v1686_v40 = vmul.f32 -1.442695, %v890_v39 }
 0x382   :  { %2104 = vpow2.f32 %v1685_v38 }
 0x383   :  { %2106 = vpow2.f32 %v1686_v40 }
 0x38c   :  { %v2105_v41 = vpop.eup %2104 }
 0x38d   :  { %v884_v44 = vadd.f32 1.0, %v2105_v41  ;;  %v2107_v46 = vpop.eup %2106 }
 0x38e   :  { %v894_v7 = vadd.f32 1.0, %v2107_v46 }
 0x38f   :  { %2108 = vrcp.f32 %v884_v44 }
 0x390   :  { %2110 = vrcp.f32 %v894_v7 }
 0x399   :  { %v2109_v9 = vpop.eup %2108 }
 0x39a   :  { %v897_v10 = vmul.f32 %v2109_v9, %v875_v8  ;;  %v2111_v15 = vpop.eup %2110  ;;  %v1009_v8 = vrot.slane %v908_v24, 2 }
 0x39b   :  { %v902_v16 = vsub.f32 1.0, %v2111_v15  ;;  %v904_v19 = vmul.f32 %v2111_v15, %v2712_v23 }
 0x39c   :  { %v900_v14 = vadd.f32 %v898_v12, %v897_v10 }
 0x39e   :  { %2112 = vtanh.f32 %v900_v14 }
 0x3a8   :  { %v2113_v17 = vpop.eup %2112 }
 0x3a9   :  { %v903_v18 = vmul.f32 %v2113_v17, %v902_v16 }
 0x3ab   :  { %v2756_v20 = vadd.f32 %v904_v19, %v903_v18 }
 0x3ad   :  { %906 = vst [vmem:[#allocation4 + $0x2] sm:$0x1] %v2756_v20  ;;  %v909_v21 = vpack.c.bf16 %v2756_v20, %v2756_v20 }
 0x3af   :  { %943 = vmatmul.mubr.bf16.vlgmr.msra.gmra.mrb[16].mxu0 %v909_v21  ;;  %1893 = vmatmul.mubr.bf16.vlgmr.msra.gmra.mrb[16].mxu1 %v909_v21  ;;  %v1019_v21 = vld [vmem:[#allocation3 + $0x4] ss:$8 sm:$0x7] }
 0x3b0   :  { %1022 = vmatpush1.bf16.msra.mxu0 %v2527_v43  ;;  %1897 = vmatpush3.bf16.msra.mxu1 %v2530_v45 }
 0x3b1   :  { %1023 = vmatprep.subr.bf16.mxu0 %v2532_v47  ;;  %1898 = vmatprep.subr.bf16.mxu1 %v2357_v0 }
 0x3b2   :  { %1053 = vmatprep.mubr.bf16.mxu0 %v2358_v1  ;;  %1912 = vmatprep.mubr.msk.bf16.mxu1 %vm2359_vm0, %v2357_v0 }
 0x3b4   :  { %1024 = vmatpush1.bf16.msra.mxu0 %v2535_v48  ;;  %1899 = vmatpush3.bf16.msra.mxu1 %v2539_v49 }
 0x3b5   :  { %1025 = vmatprep.subr.bf16.mxu0 %v2542_v50  ;;  %1900 = vmatprep.subr.bf16.mxu1 %v2357_v0 }
 0x3b8   :  { %1026 = vmatpush1.bf16.msra.mxu0 %v2548_v51  ;;  %1901 = vmatpush3.bf16.msra.mxu1 %v2552_v52 }
 0x3b9   :  { %1027 = vmatprep.subr.bf16.mxu0 %v2555_v53  ;;  %1902 = vmatprep.subr.bf16.mxu1 %v2357_v0 }
 0x3bc   :  { %1028 = vmatpush1.bf16.msra.mxu0 %v2558_v54  ;;  %1903 = vmatpush3.bf16.msra.mxu1 %v2560_v55 }
 0x3bd   :  { %1029 = vmatprep.subr.bf16.mxu0 %v2562_v56  ;;  %1904 = vmatprep.subr.bf16.mxu1 %v2357_v0 }
 0x3c0   :  { %1030 = vmatpush1.bf16.msra.mxu0 %v2569_v57  ;;  %1905 = vmatpush3.bf16.msra.mxu1 %v2572_v58 }
 0x3c1   :  { %1031 = vmatprep.subr.bf16.mxu0 %v2575_v59  ;;  %1906 = vmatprep.subr.bf16.mxu1 %v2357_v0 }
 0x3c4   :  { %1032 = vmatpush1.bf16.msra.mxu0 %v2579_v60  ;;  %1907 = vmatpush3.bf16.msra.mxu1 %v2582_v61 }
 0x3c5   :  { %1033 = vmatprep.subr.bf16.mxu0 %v2585_v62  ;;  %1908 = vmatprep.subr.bf16.mxu1 %v2357_v0 }
 0x3c8   :  { %1034 = vmatpush1.bf16.msra.mxu0 %v2589_v63  ;;  %1909 = vmatpush3.bf16.msra.mxu1 %v2592_v2 }
 0x3c9   :  { %1035 = vmatprep.subr.bf16.mxu0 %v2595_v3  ;;  %1910 = vmatprep.subr.bf16.mxu1 %v2357_v0 }
 0x3cc   :  { %1036 = vmatpush1.bf16.msra.mxu0 %v2599_v4  ;;  %1911 = vmatpush3.bf16.msra.mxu1 %v2607_v6 }
 0x3cd   :  { %1132 = vmatprep.subr.bf16.mxu0 %v2524_v42  ;;  %1916 = vmatprep.subr.bf16.mxu1 %v2357_v0 }
 0x482   :  { %v944_v22 = vpop.f32.mrb[16].mxu0  ;;  %v985_v23 = vpop.f32.mrb[16].mxu1 }
 0x483   :  { %v945_v25 = vadd.f32 %v944_v22, %v2658_v29  ;;  %v946_v26 = vpop.f32.mrb[17].mxu0  ;;  %v1894_v11 = vpop.f32.mrb[17].mxu1  ;;  %v986_v44 = vadd.f32 %v985_v23, %v2664_v13 }
 0x484   :  { %v947_v5 = vadd.f32 %v946_v26, %v2660_v30  ;;  %v948_v27 = vpop.f32.mrb[18].mxu0  ;;  %v988_v28 = vpop.f32.mrb[18].mxu1 }
 0x485   :  { %v991_v31 = vadd.f32 %v945_v25, %v908_v24  ;;  %v949_v32 = vpop.f32.mrb[19].mxu0  ;;  %v1895_v33 = vpop.f32.mrb[19].mxu1 }
 0x486   :  { %v1001_v36 = vadd.f32 %v999_v34, %v947_v5 }
 0x487   :  { %v1687_v35 = vmul.f32 -1.442695, %v991_v31  ;;  %v1110_v31 = vrot.slane %v1019_v21, 1 }
 0x488   :  { %v1688_v37 = vmul.f32 -1.442695, %v1001_v36 }
 0x489   :  { %2114 = vpow2.f32 %v1687_v35 }
 0x48a   :  { %2116 = vpow2.f32 %v1688_v37 }
 0x493   :  { %v2115_v38 = vpop.eup %2114 }
 0x494   :  { %v995_v39 = vadd.f32 1.0, %v2115_v38  ;;  %v2117_v40 = vpop.eup %2116 }
 0x495   :  { %v1005_v41 = vadd.f32 1.0, %v2117_v40 }
 0x496   :  { %2118 = vrcp.f32 %v995_v39 }
 0x497   :  { %2120 = vrcp.f32 %v1005_v41  ;;  %v1120_v41 = vrot.slane %v1019_v21, 2 }
 0x4a0   :  { %v2119_v46 = vpop.eup %2118 }
 0x4a1   :  { %v1008_v7 = vmul.f32 %v2119_v46, %v986_v44  ;;  %v2121_v10 = vpop.eup %2120 }
 0x4a2   :  { %v1013_v12 = vsub.f32 1.0, %v2121_v10  ;;  %v1015_v16 = vmul.f32 %v2121_v10, %v2756_v20 }
 0x4a3   :  { %v1011_v9 = vadd.f32 %v1009_v8, %v1008_v7 }
 0x4a5   :  { %2122 = vtanh.f32 %v1011_v9 }
 0x4af   :  { %v2123_v14 = vpop.eup %2122 }
 0x4b0   :  { %v1014_v15 = vmul.f32 %v2123_v14, %v1013_v12 }
 0x4b2   :  { %v2800_v17 = vadd.f32 %v1015_v16, %v1014_v15 }
 0x4b4   :  { %1017 = vst [vmem:[#allocation4 + $0x3] sm:$0x1] %v2800_v17  ;;  %v1020_v18 = vpack.c.bf16 %v2800_v17, %v2800_v17 }
 0x4b6   :  { %1054 = vmatmul.mubr.bf16.vlgmr.msra.gmra.mrb[20].mxu0 %v1020_v18  ;;  %1913 = vmatmul.mubr.bf16.vlgmr.msra.gmra.mrb[20].mxu1 %v1020_v18 }
 0x4b7   :  { %1133 = vmatpush1.bf16.msra.mxu0 %v2527_v43  ;;  %1917 = vmatpush3.bf16.msra.mxu1 %v2530_v45 }
 0x4b8   :  { %1134 = vmatprep.subr.bf16.mxu0 %v2532_v47  ;;  %1918 = vmatprep.subr.bf16.mxu1 %v2357_v0 }
 0x4b9   :  { %1164 = vmatprep.mubr.bf16.mxu0 %v2358_v1  ;;  %1932 = vmatprep.mubr.msk.bf16.mxu1 %vm2359_vm0, %v2357_v0 }
 0x4bb   :  { %1135 = vmatpush1.bf16.msra.mxu0 %v2535_v48  ;;  %1919 = vmatpush3.bf16.msra.mxu1 %v2539_v49 }
 0x4bc   :  { %1136 = vmatprep.subr.bf16.mxu0 %v2542_v50  ;;  %1920 = vmatprep.subr.bf16.mxu1 %v2357_v0 }
 0x4bf   :  { %1137 = vmatpush1.bf16.msra.mxu0 %v2548_v51  ;;  %1921 = vmatpush3.bf16.msra.mxu1 %v2552_v52 }
 0x4c0   :  { %1138 = vmatprep.subr.bf16.mxu0 %v2555_v53  ;;  %1922 = vmatprep.subr.bf16.mxu1 %v2357_v0 }
 0x4c3   :  { %1139 = vmatpush1.bf16.msra.mxu0 %v2558_v54  ;;  %1923 = vmatpush3.bf16.msra.mxu1 %v2560_v55 }
 0x4c4   :  { %1140 = vmatprep.subr.bf16.mxu0 %v2562_v56  ;;  %1924 = vmatprep.subr.bf16.mxu1 %v2357_v0 }
 0x4c7   :  { %1141 = vmatpush1.bf16.msra.mxu0 %v2569_v57  ;;  %1925 = vmatpush3.bf16.msra.mxu1 %v2572_v58 }
 0x4c8   :  { %1142 = vmatprep.subr.bf16.mxu0 %v2575_v59  ;;  %1926 = vmatprep.subr.bf16.mxu1 %v2357_v0 }
 0x4cb   :  { %1143 = vmatpush1.bf16.msra.mxu0 %v2579_v60  ;;  %1927 = vmatpush3.bf16.msra.mxu1 %v2582_v61 }
 0x4cc   :  { %1144 = vmatprep.subr.bf16.mxu0 %v2585_v62  ;;  %1928 = vmatprep.subr.bf16.mxu1 %v2357_v0 }
 0x4cf   :  { %1145 = vmatpush1.bf16.msra.mxu0 %v2589_v63  ;;  %1929 = vmatpush3.bf16.msra.mxu1 %v2592_v2 }
 0x4d0   :  { %1146 = vmatprep.subr.bf16.mxu0 %v2595_v3  ;;  %1930 = vmatprep.subr.bf16.mxu1 %v2357_v0 }
 0x4d3   :  { %1147 = vmatpush1.bf16.msra.mxu0 %v2599_v4  ;;  %1931 = vmatpush3.bf16.msra.mxu1 %v2607_v6 }
 0x4d4   :  { %1243 = vmatprep.subr.bf16.mxu0 %v2524_v42  ;;  %1936 = vmatprep.subr.bf16.mxu1 %v2357_v0 }
 0x589   :  { %v1055_v19 = vpop.f32.mrb[20].mxu0  ;;  %v1096_v20 = vpop.f32.mrb[20].mxu1 }
 0x58a   :  { %v1056_v22 = vadd.f32 %v1055_v19, %v2658_v29  ;;  %v1057_v23 = vpop.f32.mrb[21].mxu0  ;;  %v1914_v24 = vpop.f32.mrb[21].mxu1  ;;  %v1097_v38 = vadd.f32 %v1096_v20, %v2664_v13 }
 0x58b   :  { %v1058_v25 = vadd.f32 %v1057_v23, %v2660_v30  ;;  %v1059_v26 = vpop.f32.mrb[22].mxu0  ;;  %v1099_v11 = vpop.f32.mrb[22].mxu1 }
 0x58c   :  { %v1102_v5 = vadd.f32 %v1056_v22, %v1019_v21  ;;  %v1060_v27 = vpop.f32.mrb[23].mxu0  ;;  %v1915_v28 = vpop.f32.mrb[23].mxu1  ;;  %v2170_v26 = vld [vmem:[#allocation12 + $0x8] ss:$12 sps:$4 sm:$0xff]  }
 0x58d   :  { %v1112_v33 = vadd.f32 %v1110_v31, %v1058_v25  ;;  %v2169_v25 = vld [vmem:[#allocation12] ss:$12 sps:$4 sm:$0xff]   ;;  %v2171_v11 = vld [vmem:[#allocation12 + $0x1c] ss:$12 sps:$4 sm:$0xff]  }
 0x58e   :  { %v1689_v32 = vmul.f32 -1.442695, %v1102_v5  ;;  %v2172_v5 = vld [vmem:[#allocation12 + $0x18] ss:$12 sps:$4 sm:$0xff]   ;;  %v2173_v27 = vld [vmem:[#allocation12 + $0x20] ss:$12 sps:$4 sm:$0xff]  }
 0x58f   :  { %v1690_v42 = vmul.f32 -1.442695, %v1112_v33  ;;  %v2174_v28 = vld [vmem:[#allocation12 + $0x34] ss:$12 sps:$4 sm:$0xff]   ;;  %v2175_v31 = vld [vmem:[#allocation12 + $0x30] ss:$12 sps:$4 sm:$0xff]  }
 0x590   :  { %2124 = vpow2.f32 %v1689_v32  ;;  %v2176_v32 = vld [vmem:[#allocation12 + $0x38] ss:$12 sps:$4 sm:$0xff]  }
 0x591   :  { %2126 = vpow2.f32 %v1690_v42  ;;  %v2177_v33 = vld [vmem:[#allocation12 + $0x4c] ss:$12 sps:$4 sm:$0xff]   ;;  %v2179_v42 = vld [vmem:[#allocation12 + $0x50] ss:$12 sps:$4 sm:$0xff]  }
 0x59a   :  { %v2125_v34 = vpop.eup %2124 }
 0x59b   :  { %v1106_v35 = vadd.f32 1.0, %v2125_v34  ;;  %v2127_v36 = vpop.eup %2126  ;;  %v2180_v34 = vld [vmem:[#allocation12 + $0x64] ss:$12 sps:$4 sm:$0xff]  }
 0x59c   :  { %v1116_v37 = vadd.f32 1.0, %v2127_v36  ;;  %v2182_v36 = vld [vmem:[#allocation12 + $0x68] ss:$12 sps:$4 sm:$0xff]  }
 0x59d   :  { %2128 = vrcp.f32 %v1106_v35  ;;  %v2181_v35 = vld [vmem:[#allocation12 + $0x60] ss:$12 sps:$4 sm:$0xff]  }
 0x59e   :  { %2130 = vrcp.f32 %v1116_v37  ;;  %v2183_v37 = vld [vmem:[#allocation12 + $0x7c] ss:$12 sps:$4 sm:$0xff]  }
 0x5a7   :  { %v2129_v39 = vpop.eup %2128 }
 0x5a8   :  { %v1119_v40 = vmul.f32 %v2129_v39, %v1097_v38  ;;  %v2131_v46 = vpop.eup %2130  ;;  %v2184_v38 = vld [vmem:[#allocation12 + $0x78] ss:$12 sps:$4 sm:$0xff]   ;;  %v2185_v39 = vld [vmem:[#allocation12 + $0x80] ss:$12 sps:$4 sm:$0xff]  }
 0x5a9   :  { %v1124_v7 = vsub.f32 1.0, %v2131_v46  ;;  %v1126_v10 = vmul.f32 %v2131_v46, %v2800_v17  ;;  %v2189_v46 = vld [vmem:[#allocation12 + $0xac] ss:$12 sps:$4 sm:$0xff]  }
 0x5aa   :  { %v1122_v44 = vadd.f32 %v1120_v41, %v1119_v40  ;;  %v2186_v40 = vld [vmem:[#allocation12 + $0x94] ss:$12 sps:$4 sm:$0xff]   ;;  %v2187_v41 = vld [vmem:[#allocation12 + $0x90] ss:$12 sps:$4 sm:$0xff]  }
 0x5ac   :  { %2132 = vtanh.f32 %v1122_v44  ;;  %v2188_v44 = vld [vmem:[#allocation12 + $0x98] ss:$12 sps:$4 sm:$0xff]  }
 0x5b6   :  { %v2133_v8 = vpop.eup %2132 }
 0x5b7   :  { %v1125_v9 = vmul.f32 %v2133_v8, %v1124_v7  ;;  %v2190_v7 = vld [vmem:[#allocation12 + $0xa8] ss:$12 sps:$4 sm:$0xff]   ;;  %v2191_v8 = vld [vmem:[#allocation12 + $0xb0] ss:$12 sps:$4 sm:$0xff]  }
 0x5b9   :  { %v2844_v12 = vadd.f32 %v1126_v10, %v1125_v9 }
 0x5bb   :  { %1128 = vst [vmem:[#allocation4 + $0x4] sm:$0x1] %v2844_v12  ;;  %v1131_v14 = vpack.c.bf16 %v2844_v12, %v2844_v12 }
 0x5bd   :  { %1165 = vmatmul.mubr.bf16.vlgmr.msra.gmra.mrb[24].mxu0 %v1131_v14  ;;  %1933 = vmatmul.mubr.bf16.vlgmr.msra.gmra.mrb[24].mxu1 %v1131_v14 }
 0x5be   :  { %1244 = vmatpush1.bf16.msra.mxu0 %v2527_v43  ;;  %1937 = vmatpush3.bf16.msra.mxu1 %v2530_v45  ;;  %v2168_v43 = vld [vmem:[#allocation12 + $0x4] ss:$12 sps:$4 sm:$0xff]  }
 0x5bf   :  { %1245 = vmatprep.subr.bf16.mxu0 %v2532_v47  ;;  %1938 = vmatprep.subr.bf16.mxu1 %v2357_v0 }
 0x5c0   :  { %1275 = vmatprep.mubr.bf16.mxu0 %v2358_v1  ;;  %1952 = vmatprep.mubr.msk.bf16.mxu1 %vm2359_vm0, %v2357_v0 }
 0x5c2   :  { %1246 = vmatpush1.bf16.msra.mxu0 %v2535_v48  ;;  %1939 = vmatpush3.bf16.msra.mxu1 %v2539_v49  ;;  %v1130_v48 = vld [vmem:[#allocation3 + $0x5] ss:$8 sm:$0x7] }
 0x5c3   :  { %1247 = vmatprep.subr.bf16.mxu0 %v2542_v50  ;;  %1940 = vmatprep.subr.bf16.mxu1 %v2357_v0  ;;  %v1231_v16 = vrot.slane %v1130_v48, 2 }
 0x5c6   :  { %1248 = vmatpush1.bf16.msra.mxu0 %v2548_v51  ;;  %1941 = vmatpush3.bf16.msra.mxu1 %v2552_v52 }
 0x5c7   :  { %1249 = vmatprep.subr.bf16.mxu0 %v2555_v53  ;;  %1942 = vmatprep.subr.bf16.mxu1 %v2357_v0 }
 0x5ca   :  { %1250 = vmatpush1.bf16.msra.mxu0 %v2558_v54  ;;  %1943 = vmatpush3.bf16.msra.mxu1 %v2560_v55 }
 0x5cb   :  { %1251 = vmatprep.subr.bf16.mxu0 %v2562_v56  ;;  %1944 = vmatprep.subr.bf16.mxu1 %v2357_v0 }
 0x5ce   :  { %1252 = vmatpush1.bf16.msra.mxu0 %v2569_v57  ;;  %1945 = vmatpush3.bf16.msra.mxu1 %v2572_v58  ;;  %v1221_v58 = vrot.slane %v1130_v48, 1 }
 0x5cf   :  { %1253 = vmatprep.subr.bf16.mxu0 %v2575_v59  ;;  %1946 = vmatprep.subr.bf16.mxu1 %v2357_v0 }
 0x5d2   :  { %1254 = vmatpush1.bf16.msra.mxu0 %v2579_v60  ;;  %1947 = vmatpush3.bf16.msra.mxu1 %v2582_v61 }
 0x5d3   :  { %1255 = vmatprep.subr.bf16.mxu0 %v2585_v62  ;;  %1948 = vmatprep.subr.bf16.mxu1 %v2357_v0 }
 0x5d6   :  { %1256 = vmatpush1.bf16.msra.mxu0 %v2589_v63  ;;  %1949 = vmatpush3.bf16.msra.mxu1 %v2592_v2 }
 0x5d7   :  { %1257 = vmatprep.subr.bf16.mxu0 %v2595_v3  ;;  %1950 = vmatprep.subr.bf16.mxu1 %v2357_v0 }
 0x5da   :  { %1258 = vmatpush1.bf16.msra.mxu0 %v2599_v4  ;;  %1951 = vmatpush3.bf16.msra.mxu1 %v2607_v6 }
 0x5db   :  { %1354 = vmatprep.subr.bf16.mxu0 %v2168_v43  ;;  %1956 = vmatprep.subr.bf16.mxu1 %v2357_v0 }
 0x690   :  { %v1166_v45 = vpop.f32.mrb[24].mxu0  ;;  %v1207_v47 = vpop.f32.mrb[24].mxu1 }
 0x691   :  { %v1167_v49 = vadd.f32 %v1166_v45, %v2658_v29  ;;  %v1168_v50 = vpop.f32.mrb[25].mxu0  ;;  %v1934_v51 = vpop.f32.mrb[25].mxu1  ;;  %v1208_v4 = vadd.f32 %v1207_v47, %v2664_v13 }
 0x692   :  { %v1169_v52 = vadd.f32 %v1168_v50, %v2660_v30  ;;  %v1170_v53 = vpop.f32.mrb[26].mxu0  ;;  %v1210_v54 = vpop.f32.mrb[26].mxu1 }
 0x693   :  { %v1213_v55 = vadd.f32 %v1167_v49, %v1130_v48  ;;  %v1171_v56 = vpop.f32.mrb[27].mxu0  ;;  %v1935_v57 = vpop.f32.mrb[27].mxu1 }
 0x694   :  { %v1223_v60 = vadd.f32 %v1221_v58, %v1169_v52 }
 0x695   :  { %v1691_v59 = vmul.f32 -1.442695, %v1213_v55 }
 0x696   :  { %v1692_v61 = vmul.f32 -1.442695, %v1223_v60 }
 0x697   :  { %2134 = vpow2.f32 %v1691_v59 }
 0x698   :  { %2136 = vpow2.f32 %v1692_v61 }
 0x6a1   :  { %v2135_v62 = vpop.eup %2134 }
 0x6a2   :  { %v1217_v63 = vadd.f32 1.0, %v2135_v62  ;;  %v2137_v2 = vpop.eup %2136 }
 0x6a3   :  { %v1227_v3 = vadd.f32 1.0, %v2137_v2 }
 0x6a4   :  { %2138 = vrcp.f32 %v1217_v63 }
 0x6a5   :  { %2140 = vrcp.f32 %v1227_v3 }
 0x6ae   :  { %v2139_v6 = vpop.eup %2138 }
 0x6af   :  { %v1230_v15 = vmul.f32 %v2139_v6, %v1208_v4  ;;  %v2141_v18 = vpop.eup %2140 }
 0x6b0   :  { %v1235_v19 = vsub.f32 1.0, %v2141_v18  ;;  %v1237_v22 = vmul.f32 %v2141_v18, %v2844_v12  ;;  %v1241_v12 = vld [vmem:[#allocation3 + $0x6] ss:$8 sm:$0x7] }
 0x6b1   :  { %v1233_v17 = vadd.f32 %v1231_v16, %v1230_v15  ;;  %v1332_v53 = vrot.slane %v1241_v12, 1  ;;  %v1342_v2 = vrot.slane %v1241_v12, 2 }
 0x6b3   :  { %2142 = vtanh.f32 %v1233_v17 }
 0x6bd   :  { %v2143_v20 = vpop.eup %2142 }
 0x6be   :  { %v1236_v21 = vmul.f32 %v2143_v20, %v1235_v19  ;;  %v2076_v20 = vld [vmem:[#allocation13] sm:$0xff]  }
 0x6c0   :  { %v2887_v23 = vadd.f32 %v1237_v22, %v1236_v21  ;;  %v2077_v21 = vld [vmem:[#allocation13 + $0x8] sm:$0xff]   ;;  %v2078_v22 = vld [vmem:[#allocation13 + $0x10] sm:$0xff]  }
 0x6c2   :  { %1239 = vst [vmem:[#allocation4 + $0x5] sm:$0x1] %v2887_v23  ;;  %v1242_v24 = vpack.c.bf16 %v2887_v23, %v2887_v23 }
 0x6c4   :  { %1276 = vmatmul.mubr.bf16.vlgmr.msra.gmra.mrb[28].mxu0 %v1242_v24  ;;  %1953 = vmatmul.mubr.bf16.vlgmr.msra.gmra.mrb[28].mxu1 %v1242_v24  ;;  %v2080_v24 = vld [vmem:[#allocation13 + $0x20] sm:$0xff]  }
 0x6c5   :  { %1355 = vmatpush1.bf16.msra.mxu0 %v2169_v25  ;;  %1957 = vmatpush3.bf16.msra.mxu1 %v2170_v26  ;;  %v2081_v25 = vld [vmem:[#allocation13 + $0x28] sm:$0xff]   ;;  %v2082_v26 = vld [vmem:[#allocation13 + $0x30] sm:$0xff]  }
 0x6c6   :  { %1356 = vmatprep.subr.bf16.mxu0 %v2171_v11  ;;  %1958 = vmatprep.subr.bf16.mxu1 %v2357_v0  ;;  %v2083_v11 = vld [vmem:[#allocation13 + $0x38] sm:$0xff]  }
 0x6c7   :  { %1386 = vmatprep.mubr.bf16.mxu0 %v2358_v1  ;;  %1972 = vmatprep.mubr.msk.bf16.mxu1 %vm2359_vm0, %v2357_v0  ;;  %v2178_v1 = vld [vmem:[#allocation12 + $0x48] ss:$12 sps:$4 sm:$0xff]  }
 0x6c9   :  { %1357 = vmatpush1.bf16.msra.mxu0 %v2172_v5  ;;  %1959 = vmatpush3.bf16.msra.mxu1 %v2173_v27 }
 0x6ca   :  { %1358 = vmatprep.subr.bf16.mxu0 %v2174_v28  ;;  %1960 = vmatprep.subr.bf16.mxu1 %v2357_v0  ;;  %v1352_v28 = vld [vmem:[#allocation3 + $0x7] ss:$8 sm:$0x7] }
 0x6cd   :  { %1359 = vmatpush1.bf16.msra.mxu0 %v2175_v31  ;;  %1961 = vmatpush3.bf16.msra.mxu1 %v2176_v32 }
 0x6ce   :  { %1360 = vmatprep.subr.bf16.mxu0 %v2177_v33  ;;  %1962 = vmatprep.subr.bf16.mxu1 %v2357_v0 }
 0x6d1   :  { %1361 = vmatpush1.bf16.msra.mxu0 %v2178_v1  ;;  %1963 = vmatpush3.bf16.msra.mxu1 %v2179_v42 }
 0x6d2   :  { %1362 = vmatprep.subr.bf16.mxu0 %v2180_v34  ;;  %1964 = vmatprep.subr.bf16.mxu1 %v2357_v0 }
 0x6d5   :  { %1363 = vmatpush1.bf16.msra.mxu0 %v2181_v35  ;;  %1965 = vmatpush3.bf16.msra.mxu1 %v2182_v36 }
 0x6d6   :  { %1364 = vmatprep.subr.bf16.mxu0 %v2183_v37  ;;  %1966 = vmatprep.subr.bf16.mxu1 %v2357_v0 }
 0x6d9   :  { %1365 = vmatpush1.bf16.msra.mxu0 %v2184_v38  ;;  %1967 = vmatpush3.bf16.msra.mxu1 %v2185_v39  ;;  %v1443_v38 = vrot.slane %v1352_v28, 1 }
 0x6da   :  { %1366 = vmatprep.subr.bf16.mxu0 %v2186_v40  ;;  %1968 = vmatprep.subr.bf16.mxu1 %v2357_v0 }
 0x6dd   :  { %1367 = vmatpush1.bf16.msra.mxu0 %v2187_v41  ;;  %1969 = vmatpush3.bf16.msra.mxu1 %v2188_v44 }
 0x6de   :  { %1368 = vmatprep.subr.bf16.mxu0 %v2189_v46  ;;  %1970 = vmatprep.subr.bf16.mxu1 %v2357_v0 }
 0x6e1   :  { %1369 = vmatpush1.bf16.msra.mxu0 %v2190_v7  ;;  %1971 = vmatpush3.bf16.msra.mxu1 %v2191_v8 }
 0x6e2   :  { %1976 = vmatprep.subr.bf16.mxu0 %v2357_v0 }
 0x797   :  { %v1277_v9 = vpop.f32.mrb[28].mxu0  ;;  %v1318_v10 = vpop.f32.mrb[28].mxu1 }
 0x798   :  { %v1278_v14 = vadd.f32 %v1277_v9, %v2658_v29  ;;  %v1279_v43 = vpop.f32.mrb[29].mxu0  ;;  %v1954_v45 = vpop.f32.mrb[29].mxu1  ;;  %v1319_v61 = vadd.f32 %v1318_v10, %v2664_v13  ;;  %v1453_v9 = vrot.slane %v1352_v28, 2 }
 0x799   :  { %v1280_v47 = vadd.f32 %v1279_v43, %v2660_v30  ;;  %v1281_v48 = vpop.f32.mrb[30].mxu0  ;;  %v1321_v49 = vpop.f32.mrb[30].mxu1 }
 0x79a   :  { %v1324_v50 = vadd.f32 %v1278_v14, %v1241_v12  ;;  %v1282_v51 = vpop.f32.mrb[31].mxu0  ;;  %v1955_v52 = vpop.f32.mrb[31].mxu1 }
 0x79b   :  { %v1334_v55 = vadd.f32 %v1332_v53, %v1280_v47 }
 0x79c   :  { %v1693_v54 = vmul.f32 -1.442695, %v1324_v50 }
 0x79d   :  { %v1694_v56 = vmul.f32 -1.442695, %v1334_v55 }
 0x79e   :  { %2144 = vpow2.f32 %v1693_v54 }
 0x79f   :  { %2146 = vpow2.f32 %v1694_v56 }
 0x7a8   :  { %v2145_v57 = vpop.eup %2144 }
 0x7a9   :  { %v1328_v58 = vadd.f32 1.0, %v2145_v57  ;;  %v2147_v59 = vpop.eup %2146 }
 0x7aa   :  { %v1338_v60 = vadd.f32 1.0, %v2147_v59 }
 0x7ab   :  { %2148 = vrcp.f32 %v1328_v58 }
 0x7ac   :  { %2150 = vrcp.f32 %v1338_v60 }
 0x7b5   :  { %v2149_v62 = vpop.eup %2148 }
 0x7b6   :  { %v1341_v63 = vmul.f32 %v2149_v62, %v1319_v61  ;;  %v2151_v4 = vpop.eup %2150 }
 0x7b7   :  { %v1346_v6 = vsub.f32 1.0, %v2151_v4  ;;  %v1348_v17 = vmul.f32 %v2151_v4, %v2887_v23  ;;  %v2079_v23 = vld [vmem:[#allocation13 + $0x18] sm:$0xff]  }
 0x7b8   :  { %v1344_v3 = vadd.f32 %v1342_v2, %v1341_v63 }
 0x7ba   :  { %2152 = vtanh.f32 %v1344_v3 }
 0x7c4   :  { %v2153_v15 = vpop.eup %2152 }
 0x7c5   :  { %v1347_v16 = vmul.f32 %v2153_v15, %v1346_v6 }
 0x7c7   :  { %v2907_v18 = vadd.f32 %v1348_v17, %v1347_v16 }
 0x7c9   :  { %1350 = vst [vmem:[#allocation4 + $0x6] sm:$0x1] %v2907_v18  ;;  %v1353_v19 = vpack.c.bf16 %v2907_v18, %v2907_v18 }
 0x7cb   :  { %1387 = vmatmul.mubr.bf16.vlgmr.msra.gmra.mrb[32].mxu0 %v1353_v19  ;;  %1973 = vmatmul.mubr.bf16.vlgmr.msra.gmra.mrb[32].mxu1 %v1353_v19 }
 0x7cc   :  { %1992 = vmatprep.mubr.msk.bf16.mxu0 %vm2359_vm0, %v2357_v0  ;;  %1977 = vmatpush3.bf16.msra.mxu0 %v2076_v20 }
 0x7cd   :  { %1978 = vmatprep.subr.bf16.mxu0 %v2357_v0 }
 0x7d0   :  { %1979 = vmatpush3.bf16.msra.mxu0 %v2077_v21 }
 0x7d1   :  { %1980 = vmatprep.subr.bf16.mxu0 %v2357_v0 }
 0x7d4   :  { %1981 = vmatpush3.bf16.msra.mxu0 %v2078_v22 }
 0x7d5   :  { %1982 = vmatprep.subr.bf16.mxu0 %v2357_v0 }
 0x7d8   :  { %1983 = vmatpush3.bf16.msra.mxu0 %v2079_v23 }
 0x7d9   :  { %1984 = vmatprep.subr.bf16.mxu0 %v2357_v0 }
 0x7dc   :  { %1985 = vmatpush3.bf16.msra.mxu0 %v2080_v24 }
 0x7dd   :  { %1986 = vmatprep.subr.bf16.mxu0 %v2357_v0 }
 0x7e0   :  { %1987 = vmatpush3.bf16.msra.mxu0 %v2081_v25 }
 0x7e1   :  { %1988 = vmatprep.subr.bf16.mxu0 %v2357_v0 }
 0x7e4   :  { %1989 = vmatpush3.bf16.msra.mxu0 %v2082_v26 }
 0x7e5   :  { %1990 = vmatprep.subr.bf16.mxu0 %v2357_v0 }
 0x7e8   :  { %1991 = vmatpush3.bf16.msra.mxu0 %v2083_v11 }
 0x89e   :  { %v1388_v5 = vpop.f32.mrb[32].mxu0  ;;  %v1429_v27 = vpop.f32.mrb[32].mxu1 }
 0x89f   :  { %v1389_v31 = vadd.f32 %v1388_v5, %v2658_v29  ;;  %v1390_v32 = vpop.f32.mrb[33].mxu0  ;;  %v1974_v33 = vpop.f32.mrb[33].mxu1  ;;  %v1430_v7 = vadd.f32 %v1429_v27, %v2664_v13  ;;  %v1697_v13 = vld [vmem:[%s2960_s8] ss:$0 sm:$0xff] }
 0x8a0   :  { %v1391_v1 = vadd.f32 %v1390_v32, %v2660_v30  ;;  %v1392_v42 = vpop.f32.mrb[34].mxu0  ;;  %v1432_v34 = vpop.f32.mrb[34].mxu1 }
 0x8a1   :  { %v1435_v35 = vadd.f32 %v1389_v31, %v1352_v28  ;;  %v1393_v36 = vpop.f32.mrb[35].mxu0  ;;  %v1975_v37 = vpop.f32.mrb[35].mxu1 }
 0x8a2   :  { %v1445_v40 = vadd.f32 %v1443_v38, %v1391_v1 }
 0x8a3   :  { %v1695_v39 = vmul.f32 -1.442695, %v1435_v35 }
 0x8a4   :  { %v1696_v0 = vmul.f32 -1.442695, %v1445_v40 }
 0x8a5   :  { %2154 = vpow2.f32 %v1695_v39 }
 0x8a6   :  { %2156 = vpow2.f32 %v1696_v0 }
 0x8af   :  { %v2155_v41 = vpop.eup %2154 }
 0x8b0   :  { %v1439_v44 = vadd.f32 1.0, %v2155_v41  ;;  %v2157_v46 = vpop.eup %2156 }
 0x8b1   :  { %v1449_v29 = vadd.f32 1.0, %v2157_v46 }
 0x8b2   :  { %2158 = vrcp.f32 %v1439_v44 }
 0x8b3   :  { %2160 = vrcp.f32 %v1449_v29 }
 0x8bc   :  { %v2159_v8 = vpop.eup %2158 }
 0x8bd   :  { %v1452_v30 = vmul.f32 %v2159_v8, %v1430_v7  ;;  %v2161_v12 = vpop.eup %2160 }
 0x8be   :  { %v1457_v14 = vsub.f32 1.0, %v2161_v12  ;;  %v1459_v47 = vmul.f32 %v2161_v12, %v2907_v18 }
 0x8bf   :  { %v1455_v10 = vadd.f32 %v1453_v9, %v1452_v30 }
 0x8c1   :  { %2162 = vtanh.f32 %v1455_v10 }
 0x8cb   :  { %v2163_v43 = vpop.eup %2162 }
 0x8cc   :  { %v1458_v45 = vmul.f32 %v2163_v43, %v1457_v14 }
 0x8ce   :  { %v1460_v48 = vadd.f32 %v1459_v47, %v1458_v45 }
 0x8d0   :  { %1461 = vst [vmem:[#allocation4 + $0x7] sm:$0x1] %v1460_v48  ;;  %1462 = vst [vmem:[#allocation16] sm:$0x1] %v1460_v48 }
 0x8d7   :  { %v1463_v49 = vld [vmem:[#allocation4] sm:$0xff] }
 0x8d8   :  { %v1464_v50 = vpack.c.bf16 %v1463_v49, %v1463_v49 }
 0x8da   :  { %1993 = vmatmul.mubr.bf16.vlgmr.msra.gmra.mrb[36].mxu0 %v1464_v50 }
 0x9ad   :  { %v1570_v51 = vpop.f32.mrb[36].mxu0 }
 0x9ae   :  { %v1571_v52 = vadd.f32 %v1697_v13, %v1570_v51  ;;  %v1994_v53 = vpop.f32.mrb[37].mxu0 }
 0x9af   :  { %v1573_v54 = vpop.f32.mrb[38].mxu0 }
 0x9b0   :  { %1576 = vmax.xlane.f32.xlu0 %v1571_v52  ;;  %v1995_v55 = vpop.f32.mrb[39].mxu0 }
 0xa3d   :  { %v1577_v56 = vpop.xlane.xlu0 %1576 }
 0xa3e   :  { %v1578_v57 = vsub.f32 %v1571_v52, %v1577_v56 }
 0xa40   :  { %v1579_v58 = vmul.f32 1.442695, %v1578_v57 }
 0xa42   :  { %2164 = vpow2.f32 %v1579_v58 }
 0xa4c   :  { %v2165_v59 = vpop.eup %2164 }
 0xa4d   :  { %1581 = vadd.xlane.f32.xlu0 %v2165_v59 }
 0xa4e   :  { %2301 = shalt.err (!%p2298_p11)
}
 0xa4f   :  { %s2302_s14 = scalar_lea.hbm %s2962_s10, 16 }
 0xa50   :  { %p2303_p12 = scmp.ne.s32.totalorder %s2962_s10, %s2302_s14  ;;  %p2306_p13 = scmp.lt.u32.totalorder %s2302_s14, %s2962_s10 }
 0xa52   :  { %p2308_p0 = pnand %p2306_p13, %p2303_p12 }
 0xa54   :  { %2311 = shalt.err (!%p2308_p0)
}
 0xa55   :  { %1606 = dma.vmem_to_hbm [thread:$0]  %s1604_s12, 16, %s2962_s10, [#allocation17]  }
 0xa56   :  { %s2361_s20 = smov [#allocation15]  }
 0xa57   :  { %s1593_s21 = sshll.u32 %s2361_s20, 4  ;;  %s1594_s21 = int_to_ptr.vmem [resolvable:$true] %s1593_s21 }
 0xa58   :  { %s2312_s1 = scalar_lea.vmem %s1594_s21, 128  ;;  %p2317_p2 = scmp.lt.s32.totalorder %s1594_s21, %s1594_s21 }
 0xa59   :  { %p2313_p1 = scmp.ne.s32.totalorder %s1594_s21, %s2312_s1  ;;  %p2318_p3 = scmp.lt.s32.totalorder %s2312_s1, %s2312_s1 }
 0xa5b   :  { %p2319_p4 = por %p2318_p3, %p2317_p2 }
 0xa5d   :  { %p2320_p5 = pnand %p2319_p4, %p2313_p1 }
 0xada   :  { %v1582_v60 = vpop.xlane.xlu0 %1581 }
 0xadb   :  { %2166 = vlog2.f32 %v1582_v60 }
 0xae5   :  { %v2167_v61 = vpop.eup %2166 }
 0xae6   :  { %v1584_v62 = vmul.f32 0.6931472, %v2167_v61 }
 0xae8   :  { %v1585_v63 = vsub.f32 %v1578_v57, %v1584_v62 }
 0xaea   :  { %1586 = vst [vmem:[#allocation15] sm:$0xff] %v1585_v63 }
 0xaeb   :  { %2323 = shalt.err (!%p2320_p5)
}
 0xaec   :  { %s2324_s10 = scalar_lea.hbm %s2961_s9, 128 }
 0xaed   :  { %p2325_p6 = scmp.ne.s32.totalorder %s2961_s9, %s2324_s10  ;;  %p2328_p7 = scmp.lt.u32.totalorder %s2324_s10, %s2961_s9 }
 0xaef   :  { %p2330_p8 = pnand %p2328_p7, %p2325_p6 }
 0xaf1   :  { %2333 = shalt.err (!%p2330_p8)
}
 0xaf2   :  { %1596 = dma.vmem_to_hbm [thread:$0]  %s1594_s21, 128, %s2961_s9, [#allocation9]  }
 0xaf3   :  { %2342 = dma.done.wait [#allocation9], 128  }
 0xaf4   :  { %2343 = vsyncadd [#allocation9], 4294967168 }
 0xaf5   :  { %2344 = dma.done.wait [#allocation17], 16  }
 0xaf6   :  { %2345 = vsyncadd [#allocation17], 4294967280 }
 0xaf7   :  { %1613 = vsyncpa [#allocation8], 1 }
 0xaf8   :  { %1614 = vsyncpa [#allocation11], 1 }
 0xaf9   :  { %1615 = vsyncpa [#allocation14], 1 }
 0xafa   :  { %1616 = vsyncpa [#allocation9], 1 }
 0xafb   :  { %1617 = vsyncpa [#allocation17], 1 }

</bundles_post_ra>
